<compile_context>
chip_gen: v5e
topology: v5e:2x2
jax: 0.10.0
libtpu: 0.0.40
codegen_flags: <defaults>
</compile_context>

<pallas_src>
import functools
import math

import jax
import jax.numpy as jnp
from jax.experimental import pallas as pl
from jax.experimental.pallas import tpu as pltpu


def _round_up(x, m):
    return ((x + m - 1) // m) * m


def _pick_tile(dim_padded, cap):
    """Largest multiple of 128 that divides dim_padded and is <= cap."""
    if dim_padded <= cap:
        return dim_padded
    t = (cap // 128) * 128
    while t > 128:
        if dim_padded % t == 0:
            return t
        t -= 128
    return 128


# ---------------------------------------------------------------------------
# Pallas kernel 1: tiled matmul + bias (+ optional LeakyReLU(0.1))
#   x, w in bf16 (native MXU rate), f32 accumulator, bias in f32.
# ---------------------------------------------------------------------------
def _mm_bias_act_kernel(x_ref, w_ref, b_ref, o_ref, acc_ref, *, act):
    k = pl.program_id(2)

    @pl.when(k == 0)
    def _():
        acc_ref[...] = jnp.zeros_like(acc_ref)

    acc_ref[...] += jnp.dot(x_ref[...], w_ref[...],
                            preferred_element_type=jnp.float32)

    @pl.when(k == pl.num_programs(2) - 1)
    def _():
        y = acc_ref[...] + b_ref[...]
        if act == "leaky_relu":
            y = jnp.where(y >= 0.0, y, 0.1 * y)
        o_ref[...] = y.astype(o_ref.dtype)


def matmul_bias_act(x, wp, bp, *, act=None, out_dtype=jnp.bfloat16):
    """out = act(x @ wp + bp).

    wp : (Kp, Np) bfloat16, pre-transposed/pre-padded at init time.
    bp : (1, Np)  float32, pre-padded.
    x  : (M, K) with K <= Kp; cast to bf16 and zero-padded here.
    Returns (M, Np) in out_dtype (caller slices N if needed).
    """
    M, K = x.shape
    Kp, Np = wp.shape

    tm = 512 if M >= 512 else _round_up(M, 8)
    Mp = _round_up(M, tm)
    tn = _pick_tile(Np, 512)     # multiples of 128/256, MXU-friendly
    tk = _pick_tile(Kp, 2048)    # full K when it fits -> single K step

    xp = jnp.pad(x.astype(jnp.bfloat16), ((0, Mp - M), (0, Kp - K)))

    out = pl.pallas_call(
        functools.partial(_mm_bias_act_kernel, act=act),
        out_shape=jax.ShapeDtypeStruct((Mp, Np), out_dtype),
        grid_spec=pltpu.PrefetchScalarGridSpec(
            num_scalar_prefetch=0,
            grid=(Mp // tm, Np // tn, Kp // tk),
            in_specs=[
                pl.BlockSpec((tm, tk), lambda i, j, k: (i, k)),
                pl.BlockSpec((tk, tn), lambda i, j, k: (k, j)),
                pl.BlockSpec((1, tn), lambda i, j, k: (0, j)),
            ],
            out_specs=pl.BlockSpec((tm, tn), lambda i, j, k: (i, j)),
            scratch_shapes=[pltpu.VMEM((tm, tn), jnp.float32)],
        ),
        compiler_params=pltpu.CompilerParams(
            dimension_semantics=("parallel", "parallel", "arbitrary"),
            vmem_limit_bytes=32 * 1024 * 1024,
        ),
    )(xp, wp, bp)
    return out[:M]


# ---------------------------------------------------------------------------
# Pallas kernel 2: LSTM time recurrence for one layer (batch = 1)
#   Hidden is padded to Hp = round_up(H, 128): every gate slice is a full,
#   lane-aligned 128-wide block and the padded lanes provably stay zero
#   (zero whh rows / zero gate preactivations -> f=i=o=0.5, g=0, c_pad=0).
#   xproj : (Tp, 4*Hp) = x_t @ W_ih^T + (b_ih + b_hh)   (Pallas matmul above)
#   whh   : (Hp, 4*Hp) = padded W_hh^T.  Gate order [i, f, g, o] (PyTorch).
# ---------------------------------------------------------------------------
def _lstm_rec_kernel(xproj_ref, whh_ref, h0_ref, c0_ref,
                     hseq_ref, hT_ref, cT_ref, h_sc, c_sc, *, T, Hp):
    h_sc[...] = h0_ref[...]
    c_sc[...] = c0_ref[...]

    def step(t, carry):
        h = h_sc[...]
        c = c_sc[...]
        gates = xproj_ref[pl.ds(t, 1), :] + jnp.dot(
            h, whh_ref[...], preferred_element_type=jnp.float32)
        i = jax.nn.sigmoid(gates[:, 0 * Hp:1 * Hp])
        f = jax.nn.sigmoid(gates[:, 1 * Hp:2 * Hp])
        g = jnp.tanh(gates[:, 2 * Hp:3 * Hp])
        o = jax.nn.sigmoid(gates[:, 3 * Hp:4 * Hp])
        c_new = f * c + i * g
        h_new = o * jnp.tanh(c_new)
        h_sc[...] = h_new
        c_sc[...] = c_new
        hseq_ref[pl.ds(t, 1), :] = h_new          # per-row store, no concat
        return carry

    jax.lax.fori_loop(0, T, step, 0, unroll=True)
    hT_ref[...] = h_sc[...]
    cT_ref[...] = c_sc[...]


def lstm_recurrence(xproj, whh_p, h0, c0):
    T, G = xproj.shape
    Hp = G // 4
    Tp = _round_up(T, 8)
    xproj_p = jnp.pad(xproj, ((0, Tp - T), (0, 0)))
    vmem = pl.BlockSpec(memory_space=pltpu.MemorySpace.VMEM)
    hseq_p, hT, cT = pl.pallas_call(
        functools.partial(_lstm_rec_kernel, T=T, Hp=Hp),
        out_shape=(jax.ShapeDtypeStruct((Tp, Hp), jnp.float32),
                   jax.ShapeDtypeStruct((1, Hp), jnp.float32),
                   jax.ShapeDtypeStruct((1, Hp), jnp.float32)),
        in_specs=[vmem, vmem, vmem, vmem],
        out_specs=(vmem, vmem, vmem),
        scratch_shapes=[pltpu.VMEM((1, Hp), jnp.float32),
                        pltpu.VMEM((1, Hp), jnp.float32)],
    )(xproj_p, whh_p, h0, c0)
    return hseq_p[:T], hT, cT


# ---------------------------------------------------------------------------
# Conv (NHWC) = im2col glue + Pallas matmul/bias/LeakyReLU
#   Channels-last im2col -> matmul output (N*Ho*Wo, Cout) is already NHWC-flat,
#   so there is no layout work between conv layers.
# ---------------------------------------------------------------------------
def _im2col_nhwc(x, kh, kw, stride, pad):
    N, H, W, C = x.shape
    xp = jnp.pad(x, ((0, 0), (pad, pad), (pad, pad), (0, 0)))
    Ho = (H + 2 * pad - kh) // stride + 1
    Wo = (W + 2 * pad - kw) // stride + 1
    cols = []
    for i in range(kh):
        for j in range(kw):
            cols.append(xp[:, i:i + stride * Ho:stride,
                           j:j + stride * Wo:stride, :])   # (N, Ho, Wo, C)
    cols = jnp.concatenate(cols, axis=-1)                   # (N, Ho, Wo, kh*kw*C)
    return cols.reshape(N * Ho * Wo, kh * kw * C), Ho, Wo
    # TODO(synk): for realistic FlowNetS resolutions, fuse patch extraction into
    # the matmul kernel instead of materializing the im2col matrix in HBM.


def conv_leaky_nhwc(x, layer):
    k, s, p, cout = layer["k"], layer["stride"], layer["pad"], layer["cout"]
    cols, Ho, Wo = _im2col_nhwc(x, k, k, s, p)
    out = matmul_bias_act(cols, layer["wp"], layer["bp"],
                          act="leaky_relu", out_dtype=jnp.bfloat16)
    N = x.shape[0]
    out = out.reshape(N, Ho, Wo, -1)
    if out.shape[-1] != cout:          # only conv1 (Cout=64 padded to 128)
        out = out[..., :cout]
    return out


# ---------------------------------------------------------------------------
# Model definition (FlowNetS conv stack, as in flownets with batchNorm=False)
# ---------------------------------------------------------------------------
# (Cin, Cout, kernel, stride); padding = (kernel - 1) // 2
CONV_CFGS = [
    (6, 64, 7, 2),      # conv1
    (64, 128, 5, 2),    # conv2
    (128, 256, 5, 2),   # conv3
    (256, 256, 3, 1),   # conv3_1
    (256, 512, 3, 2),   # conv4
    (512, 512, 3, 1),   # conv4_1
    (512, 512, 3, 2),   # conv5
    (512, 512, 3, 1),   # conv5_1
    (512, 1024, 3, 2),  # conv6
    (1024, 1024, 3, 1), # conv6_1
]


def init_params(key, input_size, hidden, nlayers):
    """All weight reshaping / transposing / padding / bf16 casting done here."""
    Hp = _round_up(hidden, 128)
    params = {"conv": [], "lstm": [], "hidden": hidden, "nlayers": nlayers,
              "Hp": Hp}

    # ----- FlowNetS convs (synthetic deterministic init; no checkpoint load) --
    for (cin, cout, k, s) in CONV_CFGS:
        key, k1, k2 = jax.random.split(key, 3)
        fan_in = cin * k * k
        w = jax.random.normal(k1, (cout, cin, k, k), jnp.float32) * math.sqrt(2.0 / fan_in)
        b = jax.random.normal(k2, (cout,), jnp.float32) * 0.01
        K = cin * k * k
        Kp = _round_up(K, 128)
        Np = _round_up(cout, 128)
        # im2col column layout is [(ki, kj), cin]; weight rows must match:
        w2 = jnp.transpose(w, (2, 3, 1, 0)).reshape(K, cout)
        wp = jnp.pad(w2, ((0, Kp - K), (0, Np - cout))).astype(jnp.bfloat16)
        bp = jnp.pad(b, (0, Np - cout)).reshape(1, Np)
        params["conv"].append(dict(wp=wp, bp=bp, cout=cout, k=k,
                                   stride=s, pad=(k - 1) // 2))

    # ----- flownet_output_size(input_size) -> LSTM input feature size ---------
    h, w_ = input_size
    for (_, cout, k, s) in CONV_CFGS:
        p = (k - 1) // 2
        h = (h + 2 * p - k) // s + 1
        w_ = (w_ + 2 * p - k) // s + 1
    feat = CONV_CFGS[-1][1] * h * w_
    params["feat"] = feat

    # ----- LSTM (3 layers, PyTorch gate layout [i, f, g, o], Hp-padded) -------
    bound = 1.0 / math.sqrt(hidden)
    for l in range(nlayers):
        fin = feat if l == 0 else hidden
        # kernel-facing input width: layer 0 sees the conv feature vector,
        # deeper layers see the Hp-padded hidden sequence from the layer below.
        Kin = _round_up(feat, 128) if l == 0 else Hp
        key, k1, k2, k3, k4 = jax.random.split(key, 5)
        wih = jax.random.uniform(k1, (4 * hidden, fin), jnp.float32, -bound, bound)
        whh = jax.random.uniform(k2, (4 * hidden, hidden), jnp.float32, -bound, bound)
        bih = jax.random.uniform(k3, (4 * hidden,), jnp.float32, -bound, bound)
        bhh = jax.random.uniform(k4, (4 * hidden,), jnp.float32, -bound, bound)

        wih_tp = jnp.zeros((Kin, 4 * Hp), jnp.float32)
        whh_tp = jnp.zeros((Hp, 4 * Hp), jnp.float32)
        b_p = jnp.zeros((1, 4 * Hp), jnp.float32)
        for g in range(4):
            wih_tp = wih_tp.at[:fin, g * Hp:g * Hp + hidden].set(
                wih[g * hidden:(g + 1) * hidden, :].T)
            whh_tp = whh_tp.at[:hidden, g * Hp:g * Hp + hidden].set(
                whh[g * hidden:(g + 1) * hidden, :].T)
            b_p = b_p.at[0, g * Hp:g * Hp + hidden].set(
                bih[g * hidden:(g + 1) * hidden] + bhh[g * hidden:(g + 1) * hidden])
        params["lstm"].append(dict(wih=wih_tp.astype(jnp.bfloat16),
                                   whh=whh_tp, b=b_p))

    # ----- fc: uniform(-0.1, 0.1), bias zero (init_weights) -------------------
    key, kfc = jax.random.split(key)
    fc_w = jax.random.uniform(kfc, (6, hidden), jnp.float32, -0.1, 0.1)
    fc_b = jnp.zeros((6,), jnp.float32)
    params["fc_w"] = (jnp.zeros((Hp, 128), jnp.float32)
                      .at[:hidden, :6].set(fc_w.T).astype(jnp.bfloat16))
    params["fc_b"] = jnp.zeros((1, 128), jnp.float32).at[0, :6].set(fc_b)
    return params


def full_pose7d_forward(params, x, state=None):
    """x: (1, n, 3, H, W) float32  ->  (predictions (n-1, 6), (h_n, c_n))."""
    hidden, nlayers, Hp = params["hidden"], params["nlayers"], params["Hp"]
    x = jnp.squeeze(x, axis=0)                               # (n, 3, H, W)
    n = x.shape[0]
    # single small NCHW->NHWC transpose on the 3-channel raw input; everything
    # downstream stays channels-last / lane-dense in bf16.
    x_nhwc = jnp.transpose(x, (0, 2, 3, 1)).astype(jnp.bfloat16)
    pairs = jnp.concatenate([x_nhwc[:n - 1], x_nhwc[1:]], axis=-1)  # (n-1, H, W, 6)

    feat = pairs
    for layer in params["conv"]:
        feat = conv_leaky_nhwc(feat, layer)

    T = n - 1
    # flatten with PyTorch NCHW ordering (final feature tensor is tiny)
    seq = jnp.transpose(feat, (0, 3, 1, 2)).reshape(T, -1)

    if state is None:
        h0 = jnp.zeros((nlayers, 1, Hp), jnp.float32)
        c0 = jnp.zeros((nlayers, 1, Hp), jnp.float32)
    else:
        h_in, c_in = state
        h0 = jnp.pad(h_in.astype(jnp.float32), ((0, 0), (0, 0), (0, Hp - hidden)))
        c0 = jnp.pad(c_in.astype(jnp.float32), ((0, 0), (0, 0), (0, Hp - hidden)))

    layer_in = seq
    hTs, cTs = [], []
    for l in range(nlayers):
        lp = params["lstm"][l]
        xproj = matmul_bias_act(layer_in, lp["wih"], lp["b"],
                                act=None, out_dtype=jnp.float32)    # (T, 4*Hp)
        hseq, hT, cT = lstm_recurrence(xproj, lp["whh"], h0[l], c0[l])
        layer_in = hseq                                             # (T, Hp)
        hTs.append(hT[:, :hidden])
        cTs.append(cT[:, :hidden])

    # TODO(synk): nn.Dropout(p) with p > 0 not implemented; module default p=0 -> identity.
    preds = matmul_bias_act(layer_in, params["fc_w"], params["fc_b"],
                            act=None, out_dtype=jnp.float32)[:, :6]
    new_state = (jnp.stack(hTs, axis=0), jnp.stack(cTs, axis=0))
    return preds, new_state


if __name__ == "__main__":
    # Small but architecture-consistent shapes:
    # input_size = (64, 64) -> FlowNetS output (1, 1024, 1, 1) -> LSTM input 1024.
    hidden, nlayers = 32, 3
    n, H, W = 8, 64, 64

    params = init_params(jax.random.PRNGKey(42), (H, W), hidden, nlayers)

    x = jax.random.normal(jax.random.PRNGKey(0), (1, n, 3, H, W), jnp.float32)

    preds, (h_n, c_n) = full_pose7d_forward(params, x, state=None)
    jax.block_until_ready(preds)
    jax.block_until_ready(h_n)
    jax.block_until_ready(c_n)

    assert preds.shape == (n - 1, 6)
    assert h_n.shape == (nlayers, 1, hidden)
    assert c_n.shape == (nlayers, 1, hidden)
    assert bool(jnp.all(jnp.isfinite(preds)))
    print("KERNEL_OK")
</pallas_src>

<mosaic_0001>
module attributes {stable_mosaic.version = 11 : i64} {
  func.func @_mm_bias_act_kernel(%arg0: i32, %arg1: i32, %arg2: i32, %arg3: memref<512x384xbf16, #tpu.memory_space<vmem>>, %arg4: memref<384x128xbf16, #tpu.memory_space<vmem>>, %arg5: memref<1x128xf32, #tpu.memory_space<vmem>>, %arg6: memref<512x128xbf16, #tpu.memory_space<vmem>>, %arg7: memref<512x128xf32, #tpu.memory_space<vmem>>) attributes {dimension_semantics = [#tpu.dimension_semantics<parallel>, #tpu.dimension_semantics<parallel>, #tpu.dimension_semantics<arbitrary>], iteration_bounds = array<i64: 14, 1, 1>, scalar_prefetch = 0 : i64, scratch_operands = 1 : i64, tpu.core_type = #tpu.core_type<tc>, window_params = [{transform_indices = @transform_0, window_bounds = array<i64: 512, 384>}, {transform_indices = @transform_1, window_bounds = array<i64: 384, 128>}, {transform_indices = @transform_2, window_bounds = array<i64: 1, 128>}, {transform_indices = @transform_3, window_bounds = array<i64: 512, 128>}]} {
    %c0_i32 = arith.constant 0 : i32
    %0 = arith.cmpi eq, %arg2, %c0_i32 : i32
    %1 = arith.extui %0 : i1 to i32
    %c0_i32_0 = arith.constant 0 : i32
    %2 = arith.cmpi ne, %1, %c0_i32_0 : i32
    scf.if %2 {
      %cst_10 = arith.constant 0.000000e+00 : f32
      %12 = vector.broadcast %cst_10 : f32 to vector<512x128xf32>
      %c0_11 = arith.constant 0 : index
      %c0_12 = arith.constant 0 : index
      %13 = vector.load %arg7[%c0_11, %c0_12] : memref<512x128xf32, #tpu.memory_space<vmem>>, vector<512x128xf32>
      tpu.vector_store %arg7[%c0_11, %c0_12], %12 {strides = array<i32>} : memref<512x128xf32, #tpu.memory_space<vmem>>, vector<512x128xf32>,
    } else {
    }
    %c0 = arith.constant 0 : index
    %c0_1 = arith.constant 0 : index
    %3 = vector.load %arg7[%c0, %c0_1] : memref<512x128xf32, #tpu.memory_space<vmem>>, vector<512x128xf32>
    %c0_2 = arith.constant 0 : index
    %c0_3 = arith.constant 0 : index
    %4 = vector.load %arg3[%c0_2, %c0_3] : memref<512x384xbf16, #tpu.memory_space<vmem>>, vector<512x384xbf16>
    %c0_4 = arith.constant 0 : index
    %c0_5 = arith.constant 0 : index
    %5 = vector.load %arg4[%c0_4, %c0_5] : memref<384x128xbf16, #tpu.memory_space<vmem>>, vector<384x128xbf16>
    %cst = arith.constant dense<0.000000e+00> : vector<512x128xf32>
    %6 = tpu.matmul %4, %5, %cst {dimension_numbers = #tpu.dot_dimension_numbers<[1], [0], [0], [1], [0, 0, 1, 1], [], []>} : vector<512x384xbf16>, vector<384x128xbf16>, vector<512x128xf32> -> vector<512x128xf32>
    %7 = arith.addf %3, %6 : vector<512x128xf32>
    %c0_6 = arith.constant 0 : index
    %c0_7 = arith.constant 0 : index
    %8 = vector.load %arg7[%c0_6, %c0_7] : memref<512x128xf32, #tpu.memory_space<vmem>>, vector<512x128xf32>
    tpu.vector_store %arg7[%c0_6, %c0_7], %7 {strides = array<i32>} : memref<512x128xf32, #tpu.memory_space<vmem>>, vector<512x128xf32>,
    %c0_i32_8 = arith.constant 0 : i32
    %9 = arith.cmpi eq, %arg2, %c0_i32_8 : i32
    %10 = arith.extui %9 : i1 to i32
    %c0_i32_9 = arith.constant 0 : i32
    %11 = arith.cmpi ne, %10, %c0_i32_9 : i32
    scf.if %11 {
      %c0_10 = arith.constant 0 : index
      %c0_11 = arith.constant 0 : index
      %12 = vector.load %arg7[%c0_10, %c0_11] : memref<512x128xf32, #tpu.memory_space<vmem>>, vector<512x128xf32>
      %c0_12 = arith.constant 0 : index
      %c0_13 = arith.constant 0 : index
      %13 = vector.load %arg5[%c0_12, %c0_13] : memref<1x128xf32, #tpu.memory_space<vmem>>, vector<1x128xf32>
      %14 = vector.broadcast %13 : vector<1x128xf32> to vector<512x128xf32>
      %15 = arith.addf %12, %14 : vector<512x128xf32>
      %cst_14 = arith.constant 0.000000e+00 : f32
      %16 = vector.broadcast %cst_14 : f32 to vector<512x128xf32>
      %17 = arith.cmpf oge, %15, %16 : vector<512x128xf32>
      %cst_15 = arith.constant 1.000000e-01 : f32
      %18 = vector.broadcast %cst_15 : f32 to vector<512x128xf32>
      %19 = arith.mulf %18, %15 : vector<512x128xf32>
      %20 = arith.select %17, %15, %19 : vector<512x128xi1>, vector<512x128xf32>
      %21 = arith.truncf %20 : vector<512x128xf32> to vector<512x128xbf16>
      %c0_16 = arith.constant 0 : index
      %c0_17 = arith.constant 0 : index
      %22 = vector.load %arg6[%c0_16, %c0_17] : memref<512x128xbf16, #tpu.memory_space<vmem>>, vector<512x128xbf16>
      tpu.vector_store %arg6[%c0_16, %c0_17], %21 {strides = array<i32>} : memref<512x128xbf16, #tpu.memory_space<vmem>>, vector<512x128xbf16>,
    } else {
    }
    return
  }
  func.func @transform_0(%arg0: i32, %arg1: i32, %arg2: i32) -> (i32, i32) {
    %c0_i32 = arith.constant 0 : i32
    return %arg0, %arg2 : i32, i32
  }
  func.func @transform_1(%arg0: i32, %arg1: i32, %arg2: i32) -> (i32, i32) {
    %c0_i32 = arith.constant 0 : i32
    return %arg2, %arg1 : i32, i32
  }
  func.func @transform_2(%arg0: i32, %arg1: i32, %arg2: i32) -> (i32, i32) {
    %c0_i32 = arith.constant 0 : i32
    %c0_i32_0 = arith.constant 0 : i32
    return %c0_i32, %arg1 : i32, i32
  }
  func.func @transform_3(%arg0: i32, %arg1: i32, %arg2: i32) -> (i32, i32) {
    %c0_i32 = arith.constant 0 : i32
    return %arg0, %arg1 : i32, i32
  }
}

</mosaic_0001>

<bundles_post_ra>
// kernel: tpu_custom_call.1
= control target key start
LH: loop header
LB: loop body
LE: loop exit
PB: predicated region body
PF: predicated region fallthrough
CT: control target
= control target key end

     0   :  { %8 = vsyncpa [#allocation4], 0  ;;  %s4165_s0 = inlined_call_operand.hbm [shape: bf16[7168,384], index: 0, kind: input, shape index: {}]   ;;  %s4166_s1 = inlined_call_operand.hbm [shape: bf16[384,128], index: 1, kind: input, shape index: {}]   ;;  %s4167_s2 = inlined_call_operand.hbm [shape: f32[1,128], index: 2, kind: input, shape index: {}]   ;;  %s4168_s3 = inlined_call_operand.hbm [shape: bf16[7168,128], index: 3, kind: output, shape index: {}]  }
   0x1   :  { %10 = vsyncpa [#allocation4 + $0x1], 0 }
   0x2   :  { %11 = vsyncpa [#allocation7], 0 }
   0x3   :  { %12 = vsyncpa [#allocation5], 0 }
   0x4   :  { %14 = vsyncpa [#allocation5 + $0x1], 0  ;;  %s3587_s12 = smov 0   ;;  %s3589_s13 = smov 0  }
   0x5   :  { %s3591_s14 = smov 0   ;;  %s3593_s15 = smov 0  }
   0x6   :  { %s3595_s16 = smov 0   ;;  %s3597_s17 = smov 0  }
   0x7 LB: > { %s2453_s18 = sadd.s32 4294967295, %s3557_s17   ;;  %s2454_s19 = sadd.s32 4294967294, %s3557_s17   ;;  %s3557_s17 = sphi %s3597_s17, %s20_s17   ;;  %s3553_s16 = sphi %s3595_s16, %s4179_s16   ;;  %s3549_s15 = sphi %s3593_s15, %s4178_s15   ;;  %s3545_s14 = sphi %s3591_s14, %s4177_s14   ;;  %s3541_s13 = sphi %s3589_s13, %s4176_s13   ;;  %s3537_s12 = sphi %s3587_s12, %s4175_s12  }
   0x8   : > { %p61_p0 = scmp.ne.s32.totalorder %s3541_s13, %s3537_s12  ;;  %p3621_p1 = scmp.eq.s32.totalorder %s2453_s18, 0 }
   0x9   : > { %p3625_p2 = scmp.eq.s32.totalorder %s2453_s18, 13  ;;  %p147_p3 = scmp.eq.s32.totalorder %s2454_s19, 13 }
   0xa   : > { %p3631_p4 = por %p3621_p1, %p61_p0  ;;  %p2455_p5 = scmp.ge.s32.totalorder %s3557_s17, 1 }
   0xb   : > { %p3636_p6 = por %p147_p3, %p61_p0  ;;  %p154_p7 = scmp.lt.s32.totalorder %s3557_s17, 15 }
   0xc   : > { %s169_s26 = sshll.u32 %s4166_s1, 4  ;;  %s3559_s28 = smov [#allocation6]   ;;  %s170_s26 = int_to_ptr.hbm [resolvable:$true] %s169_s26 }
   0xd   : > { %p3644_p8 = pnand %p2455_p5, %p154_p7  ;;  %s171_s29 = sshll.u32 %s3559_s28, 4  ;;  %s172_s29 = int_to_ptr.vmem [resolvable:$true] %s171_s29 }
   0xe   : > { %s185_s5 = sshll.u32 %s4167_s2, 4  ;;  %s3560_s6 = smov 64   ;;  %s186_s5 = int_to_ptr.hbm [resolvable:$true] %s185_s5 }
   0xf   : > { %p3302_p9 = pneg %p3644_p8  ;;  %s3561_s7 = smov 4  }
  0x10   : > { %s3562_s8 = smov [#allocation8]   ;;  %s39_s10 = sadd.s32 1, %s3553_s16 }
  0x11   : > { %p3303_p10 = pnand %p3302_p9, %p3621_p1  ;;  %s187_s9 = sshll.u32 %s3562_s8, 4  ;;  %s188_s9 = int_to_ptr.vmem [resolvable:$true] %s187_s9 }
  0x12   : > { %s48_s11 = sadd.s32 1, %s3545_s14  ;;  %p41_p11 = scmp.ge.s32.totalorder %s39_s10, 14 }
  0x13   : > { %3305 = dma.hbm_to_vmem [thread:$0]  (!%p3303_p10), %s170_s26, 3072, %s172_s29, [#allocation7], %s3560_s6, %s3560_s6, %s3561_s7  }
  0x14   : > { %3308 = dma.hbm_to_vmem [thread:$0]  (!%p3303_p10), %s186_s5, 16, %s188_s9, [#allocation7]  }
  0x15   : > { %p55_p12 = scmp.ne.s32.totalorder %s3545_s14, %s3541_s13  ;;  %p56_p13 = scmp.eq.s32.totalorder %s3557_s17, 0 }
  0x16   : > { %p3319_p0 = scmp.lt.s32.totalorder %s3557_s17, 14  ;;  %s4181_s10 = smov (%p41_p11, %s39_s10), 0 }
  0x17   : > { %p57_p3 = por %p56_p13, %p55_p12  ;;  %p3665_p5 = por %p3625_p2, %p55_p12 }
  0x18   : > { %s43_s19 = ssub.s32 %s3553_s16, %s4181_s10  ;;  %s198_s24 = sand.u32 1, %s3545_s14  }
  0x19   : > { %p46_p7 = scmp.eq.s32.totalorder %s43_s19, 0  ;;  %s3287_s25 = smul.u32 768, %s198_s24 }
  0x1a   : > { %p3310_p9 = pnand %p3319_p0, %p57_p3  ;;  %s3288_s28 = smul.u32 768, %s3553_s16 }
  0x1b   : > { %s3673_s26 = scalar_select %p46_p7, %s3545_s14, %s48_s11  }
  0x1c   : > { %s202_s29 = scalar_lea.vmem [#allocation3], %s3287_s25  ;;  %s210_s6 = scalar_lea.hbm %s4165_s0, %s3288_s28 }
  0x1d   : > { %s213_s30 = sshll.u32 %s202_s29, 4  ;;  %s211_s21 = sshll.u32 %s210_s6, 4  ;;  %s214_s30 = int_to_ptr.vmem [resolvable:$true] %s213_s30  ;;  %s212_s21 = int_to_ptr.hbm [resolvable:$true] %s211_s21 }
  0x1e   : > { %s199_s7 = scalar_lea.sflag [#allocation4], %s198_s24  ;;  %s3563_s8 = smov 192  }
  0x1f   : > { %s3564_s9 = smov 12   ;;  %225 = sbr.rel (%p3644_p8) target bundleno = 595 (0x253), region = 32 }
  0x20   : > { %3312 = dma.hbm_to_vmem [thread:$0]  (!%p3310_p9), %s212_s21, 12288, %s214_s30, %s199_s7, %s3563_s8, %s3563_s8, %s3564_s9  }
  0x21   : > { %s3682_s11 = sand.u32 (!%p3644_p8), 1, %s3541_s13  }
  0x22   : > { %s3289_s19 = smul.u32 (!%p3644_p8), 768, %s3682_s11  ;;  %s228_s25 = scalar_lea.sflag (!%p3644_p8), [#allocation4], %s3682_s11 }
  0x24   : > { %s3686_s29 = scalar_lea.vmem [#allocation3], %s3289_s19 }
  0x25   : > { %3524 = dma.done.wait (%p3631_p4), %s228_s25, 12288  }
  0x26   : > { %3526 = vsyncadd (%p3631_p4), %s228_s25, 4294955008 }
  0x27   : > { %3528 = dma.done.wait (%p3621_p1), [#allocation7], 3088  }
  0x28   : > { %3530 = vsyncadd (%p3621_p1), [#allocation7], 4294964208  ;;  %v3054_v0 = vld [vmem:[#allocation6 + $0x38] sm:$0xff]  ;;  %v3053_v3 = vld [vmem:[#allocation6 + $0x30] sm:$0xff]  ;;  %s2465_s20 = sshll.u32 %s3682_s11, 8  ;;  %s3071_s27 = sshll.u32 %s3549_s15, 8 }
  0x29   : > { %v3696_v1 = vld [vmem:[#allocation6 + $0x78] sm:$0xff]  ;;  %1233 = vmatpush.bf16.msra.mxu0 %v3054_v0  ;;  %3263 = vmatpush.bf16.msra.mxu3 %v3054_v0  ;;  %v3702_v4 = vld [vmem:[#allocation6 + $0x70] sm:$0xff]  ;;  %v3052_v6 = vld [vmem:[#allocation6 + $0x28] sm:$0xff]  ;;  %s3827_s22 = scalar_lea.vmem [#allocation9], %s2465_s20  ;;  %s2336_s30 = scalar_lea.hbm %s4168_s3, %s3071_s27 }
  0x2a   : > { %v3698_v2 = vld [vmem:[#allocation6 + $0xb8] sm:$0xff]  ;;  %1402 = vmatpush.bf16.msra.mxu1 %v3696_v1  ;;  %v3704_v5 = vld [vmem:[#allocation6 + $0xb0] sm:$0xff]  ;;  %v3060_v7 = vld [vmem:[#allocation6 + $0x68] sm:$0xff]  ;;  %s2337_s15 = sshll.u32 %s3827_s22, 4  ;;  %s2339_s4 = sshll.u32 %s2336_s30, 4  ;;  %s2338_s15 = int_to_ptr.vmem [resolvable:$true] %s2337_s15  ;;  %s2340_s4 = int_to_ptr.hbm [resolvable:$true] %s2339_s4 }
  0x2b   : > { %1571 = vmatpush.bf16.msra.mxu2 %v3698_v2  ;;  %v3708_v8 = vld [vmem:[#allocation6 + $0xa8] sm:$0xff]  ;;  %v3051_v9 = vld [vmem:[#allocation6 + $0x20] sm:$0xff]  ;;  %v3050_v12 = vld [vmem:[#allocation6 + $0x18] sm:$0xff]  ;;  %s2324_s5 = scalar_lea.sflag [#allocation5], %s3682_s11  ;;  %s3485_s6 = sshra.s32 %s2340_s4, 4  ;;  %s3486_s6 = int_to_ptr.hbm [resolvable:$true] %s3485_s6 }
  0x2c   : > { %v3059_v10 = vld [vmem:[#allocation6 + $0x60] sm:$0xff]  ;;  %v3058_v13 = vld [vmem:[#allocation6 + $0x58] sm:$0xff]  ;;  %v3049_v15 = vld [vmem:[#allocation6 + $0x10] sm:$0xff]  ;;  %s3487_s21 = scalar_lea.hbm %s3486_s6, 256  ;;  %s3491_s9 = scalar_lea.hbm %s4168_s3, 3584 }
  0x2d   : > { %1234 = vmatpush.bf16.msra.mxu0 %v3053_v3  ;;  %3264 = vmatpush.bf16.msra.mxu3 %v3053_v3  ;;  %v3711_v11 = vld [vmem:[#allocation6 + $0xa0] sm:$0xff]  ;;  %v3714_v14 = vld [vmem:[#allocation6 + $0x98] sm:$0xff]  ;;  %v3057_v16 = vld [vmem:[#allocation6 + $0x50] sm:$0xff]  ;;  %p3488_p1 = scmp.ne.s32.totalorder %s3486_s6, %s3487_s21  ;;  %p3492_p8 = scmp.lt.s32.totalorder %s3486_s6, %s4168_s3 }
  0x2e   : > { %1403 = vmatpush.bf16.msra.mxu1 %v3702_v4  ;;  %v3717_v17 = vld [vmem:[#allocation6 + $0x90] sm:$0xff]  ;;  %v3048_v18 = vld [vmem:[#allocation6 + $0x8] sm:$0xff]  ;;  %v3047_v21 = vld [vmem:[#allocation6] sm:$0xff]  ;;  %p3493_p10 = scmp.lt.s32.totalorder %s3491_s9, %s3487_s21 }
  0x2f   : > { %1572 = vmatpush.bf16.msra.mxu2 %v3704_v5  ;;  %v3056_v19 = vld [vmem:[#allocation6 + $0x48] sm:$0xff]  ;;  %v3055_v22 = vld [vmem:[#allocation6 + $0x40] sm:$0xff]  ;;  %v2470_v29 = vld [vmem:[%s3686_s29 + $0xc] sm:$0xf0]  ;;  %p3489_p2 = pnand %p3488_p1, %p3665_p5 }
  0x30   : > { %v3720_v20 = vld [vmem:[#allocation6 + $0x88] sm:$0xff]  ;;  %v3722_v23 = vld [vmem:[#allocation6 + $0x80] sm:$0xff]  ;;  %v2953_v31 = vld [vmem:[%s3686_s29 + $0x10] sm:$0xf0]  ;;  %p3494_p11 = por %p3493_p10, %p3492_p8 }
  0x31   : > { %1235 = vmatpush.bf16.msra.mxu0 %v3052_v6  ;;  %3265 = vmatpush.bf16.msra.mxu3 %v3052_v6  ;;  %v2468_v24 = vld [vmem:[%s3686_s29] sm:$0xf]  ;;  %v2952_v25 = vld [vmem:[%s3686_s29 + $0x8] sm:$0xf0]  ;;  %v2951_v28 = vld [vmem:[%s3686_s29 + $0x4] sm:$0xf]  ;;  %p3490_p4 = pneg %p3489_p2 }
  0x32   : > { %1404 = vmatpush.bf16.msra.mxu1 %v3060_v7  ;;  %v2756_v26 = vld [vmem:[%s3686_s29 + $0x240] sm:$0xf]  ;;  %v3024_v27 = vld [vmem:[%s3686_s29 + $0x248] sm:$0xf0]  ;;  %v2476_v30 = vld [vmem:[%s3686_s29 + $0x8] sm:$0xf]  ;;  %v2469_v32 = vor.u32 %v2952_v25, %v2468_v24  ;;  %v2473_v34 = vor.u32 %v2951_v28, %v2470_v29 }
  0x33   : > { %1573 = vmatpush.bf16.msra.mxu2 %v3708_v8  ;;  %v2757_v33 = vor.u32 %v3024_v27, %v2756_v26  ;;  %v2477_v35 = vor.u32 %v2953_v31, %v2476_v30  ;;  %v2480_v36 = vld [vmem:[%s3686_s29 + $0x18] sm:$0xf]  ;;  %v2955_v37 = vld [vmem:[%s3686_s29 + $0x20] sm:$0xf0]  ;;  %v2954_v40 = vld [vmem:[%s3686_s29 + $0x1c] sm:$0xf]  ;;  %p3495_p12 = pnand %p3494_p11, %p3490_p4 }
  0x34   : > { %v2768_v38 = vld [vmem:[%s3686_s29 + $0x258] sm:$0xf]  ;;  %v3027_v39 = vld [vmem:[%s3686_s29 + $0x260] sm:$0xf0]  ;;  %v2482_v41 = vld [vmem:[%s3686_s29 + $0x24] sm:$0xf0]  ;;  %v2481_v44 = vor.u32 %v2955_v37, %v2480_v36 }
  0x35   : > { %1236 = vmatpush.bf16.msra.mxu0 %v3051_v9  ;;  %3266 = vmatpush.bf16.msra.mxu3 %v3051_v9  ;;  %v2488_v42 = vld [vmem:[%s3686_s29 + $0x20] sm:$0xf]  ;;  %v2956_v43 = vld [vmem:[%s3686_s29 + $0x28] sm:$0xf0]  ;;  %v2769_v45 = vor.u32 %v3027_v39, %v2768_v38  ;;  %v2485_v46 = vor.u32 %v2954_v40, %v2482_v41  ;;  %v2492_v48 = vld [vmem:[%s3686_s29 + $0x30] sm:$0xf] }
  0x36   : > { %1405 = vmatpush.bf16.msra.mxu1 %v3059_v10  ;;  %v2489_v47 = vor.u32 %v2956_v43, %v2488_v42  ;;  %v2958_v49 = vld [vmem:[%s3686_s29 + $0x38] sm:$0xf0]  ;;  %v2780_v50 = vld [vmem:[%s3686_s29 + $0x270] sm:$0xf]  ;;  %v2957_v52 = vld [vmem:[%s3686_s29 + $0x34] sm:$0xf] }
  0x37   : > { %1574 = vmatpush.bf16.msra.mxu2 %v3711_v11  ;;  %v3030_v51 = vld [vmem:[%s3686_s29 + $0x278] sm:$0xf0]  ;;  %v2494_v53 = vld [vmem:[%s3686_s29 + $0x3c] sm:$0xf0]  ;;  %v2500_v54 = vld [vmem:[%s3686_s29 + $0x38] sm:$0xf]  ;;  %v2493_v56 = vor.u32 %v2958_v49, %v2492_v48 }
  0x38   : > { %v2959_v55 = vld [vmem:[%s3686_s29 + $0x40] sm:$0xf0]  ;;  %v2781_v57 = vor.u32 %v3030_v51, %v2780_v50  ;;  %v2497_v58 = vor.u32 %v2957_v52, %v2494_v53  ;;  %v2504_v60 = vld [vmem:[%s3686_s29 + $0x48] sm:$0xf]  ;;  %v2961_v61 = vld [vmem:[%s3686_s29 + $0x50] sm:$0xf0] }
  0x39   : > { %1237 = vmatpush.bf16.msra.mxu0 %v3050_v12  ;;  %3267 = vmatpush.bf16.msra.mxu3 %v3050_v12  ;;  %v2501_v59 = vor.u32 %v2959_v55, %v2500_v54  ;;  %v2792_v62 = vld [vmem:[%s3686_s29 + $0x288] sm:$0xf]  ;;  %v3033_v63 = vld [vmem:[%s3686_s29 + $0x290] sm:$0xf0]  ;;  %v2960_v0 = vld [vmem:[%s3686_s29 + $0x4c] sm:$0xf] }
  0x3a   : > { %1406 = vmatpush.bf16.msra.mxu1 %v3058_v13  ;;  %v2962_v3 = vld [vmem:[%s3686_s29 + $0x58] sm:$0xf0]  ;;  %v2964_v9 = vld [vmem:[%s3686_s29 + $0x68] sm:$0xf0]  ;;  %v2963_v12 = vld [vmem:[%s3686_s29 + $0x64] sm:$0xf] }
  0x3b   : > { %1575 = vmatpush.bf16.msra.mxu2 %v3714_v14  ;;  %v3039_v24 = vld [vmem:[%s3686_s29 + $0x2c0] sm:$0xf0]  ;;  %v2966_v25 = vld [vmem:[%s3686_s29 + $0x7c] sm:$0xf]  ;;  %v2536_v26 = vld [vmem:[%s3686_s29 + $0x80] sm:$0xf] }
  0x3c   : > { %v2968_v27 = vld [vmem:[%s3686_s29 + $0x88] sm:$0xf0]  ;;  %v2969_v36 = vld [vmem:[%s3686_s29 + $0x94] sm:$0xf]  ;;  %v2542_v37 = vld [vmem:[%s3686_s29 + $0x9c] sm:$0xf0] }
  0x3d   : > { %1238 = vmatpush.bf16.msra.mxu0 %v3049_v15  ;;  %3268 = vmatpush.bf16.msra.mxu3 %v3049_v15  ;;  %v2965_v15 = vld [vmem:[%s3686_s29 + $0x70] sm:$0xf0]  ;;  %v2537_v31 = vor.u32 %v2968_v27, %v2536_v26  ;;  %v2548_v38 = vld [vmem:[%s3686_s29 + $0x98] sm:$0xf]  ;;  %v2971_v39 = vld [vmem:[%s3686_s29 + $0xa0] sm:$0xf0]  ;;  %v2545_v42 = vor.u32 %v2969_v36, %v2542_v37 }
  0x3e   : > { %1407 = vmatpush.bf16.msra.mxu1 %v3057_v16  ;;  %v2549_v43 = vor.u32 %v2971_v39, %v2548_v38  ;;  %v2972_v48 = vld [vmem:[%s3686_s29 + $0xac] sm:$0xf]  ;;  %v2554_v49 = vld [vmem:[%s3686_s29 + $0xb4] sm:$0xf0]  ;;  %v2560_v50 = vld [vmem:[%s3686_s29 + $0xb0] sm:$0xf] }
  0x3f   : > { %1576 = vmatpush.bf16.msra.mxu2 %v3717_v17  ;;  %v2974_v51 = vld [vmem:[%s3686_s29 + $0xb8] sm:$0xf0]  ;;  %v2557_v54 = vor.u32 %v2972_v48, %v2554_v49  ;;  %v2782_v48 = vld [vmem:[%s3686_s29 + $0x27c] sm:$0xf0] }
  0x40   : > { %v2561_v55 = vor.u32 %v2974_v51, %v2560_v50  ;;  %v2590_v49 = vld [vmem:[%s3686_s29 + $0xfc] sm:$0xf0]  ;;  %v2596_v50 = vld [vmem:[%s3686_s29 + $0xf8] sm:$0xf]  ;;  %v2983_v51 = vld [vmem:[%s3686_s29 + $0x100] sm:$0xf0] }
  0x41   : > { %1239 = vmatpush.bf16.msra.mxu0 %v3048_v18  ;;  %3269 = vmatpush.bf16.msra.mxu3 %v3048_v18 }
  0x42   : > { %1408 = vmatpush.bf16.msra.mxu1 %v3056_v19 }
  0x43   : > { %1577 = vmatpush.bf16.msra.mxu2 %v3720_v20 }
  0x45   : > { %1240 = vmatpush.bf16.msra.mxu0 %v3047_v21  ;;  %3270 = vmatpush.bf16.msra.mxu3 %v3047_v21  ;;  %v2967_v21 = vld [vmem:[%s3686_s29 + $0x80] sm:$0xf0] }
  0x46   : > { %1409 = vmatpush.bf16.msra.mxu1 %v3055_v22 }
  0x47   : > { %1578 = vmatpush.bf16.msra.mxu2 %v3722_v23 }
  0x48   : > { %1241 = vmatmul.bf16.vlgmr.msra.gmra.mxu0 %v2469_v32  ;;  %1361 = vmatmul.bf16.vlgmr.msra.gmra.mxu3 %v2757_v33  ;;  %v2540_v32 = vld [vmem:[%s3686_s29 + $0x90] sm:$0xf]  ;;  %v2970_v33 = vld [vmem:[%s3686_s29 + $0x98] sm:$0xf0] }
  0x49   : > { %3271 = vmatpush.bf16.msrb.mxu3 %v3696_v1  ;;  %1410 = vmatmul.bf16.vlgmr.msra.gmra.mxu1 %v2473_v34  ;;  %v2506_v1 = vld [vmem:[%s3686_s29 + $0x54] sm:$0xf0]  ;;  %v2828_v34 = vld [vmem:[%s3686_s29 + $0x2d0] sm:$0xf]  ;;  %v2541_v40 = vor.u32 %v2970_v33, %v2540_v32 }
  0x4a   : > { %1579 = vmatmul.bf16.vlgmr.msra.gmra.mxu2 %v2477_v35  ;;  %v2509_v6 = vor.u32 %v2960_v0, %v2506_v1  ;;  %v3042_v35 = vld [vmem:[%s3686_s29 + $0x2d8] sm:$0xf0] }
  0x4b   : > { %v2829_v41 = vor.u32 %v3042_v35, %v2828_v34 }
  0x4d   : > { %3272 = vmatpush.bf16.msrb.mxu3 %v3702_v4  ;;  %v2505_v4 = vor.u32 %v2961_v61, %v2504_v60  ;;  %v2758_v60 = vld [vmem:[%s3686_s29 + $0x24c] sm:$0xf0] }
  0x4e   : > { %v2566_v61 = vld [vmem:[%s3686_s29 + $0xcc] sm:$0xf0] }
  0x51   : > { %3273 = vmatpush.bf16.msrb.mxu3 %v3060_v7 }
  0x55   : > { %3274 = vmatpush.bf16.msrb.mxu3 %v3059_v10  ;;  %v2804_v10 = vld [vmem:[%s3686_s29 + $0x2a0] sm:$0xf] }
  0x58   : > { %1246 = vmatmul.bf16.gmra.mxu0 %v2481_v44  ;;  %1366 = vmatmul.bf16.gmra.mxu3 %v2769_v45  ;;  %v2552_v44 = vld [vmem:[%s3686_s29 + $0xa8] sm:$0xf]  ;;  %v2973_v45 = vld [vmem:[%s3686_s29 + $0xb0] sm:$0xf0] }
  0x59   : > { %3275 = vmatpush.bf16.msrb.mxu3 %v3058_v13  ;;  %1415 = vmatmul.bf16.gmra.mxu1 %v2485_v46  ;;  %v2518_v13 = vld [vmem:[%s3686_s29 + $0x6c] sm:$0xf0]  ;;  %v2840_v46 = vld [vmem:[%s3686_s29 + $0x2e8] sm:$0xf]  ;;  %v2553_v52 = vor.u32 %v2973_v45, %v2552_v44  ;;  %v2982_v45 = vld [vmem:[%s3686_s29 + $0xf8] sm:$0xf0] }
  0x5a   : > { %1584 = vmatmul.bf16.gmra.mxu2 %v2489_v47  ;;  %v2521_v18 = vor.u32 %v2963_v12, %v2518_v13  ;;  %v3045_v47 = vld [vmem:[%s3686_s29 + $0x2f0] sm:$0xf0]  ;;  %v3810_v12 = vld [vmem:[#allocation8] ss:$0 sm:$0xff]  ;;  %v2576_v13 = vld [vmem:[%s3686_s29 + $0xd8] sm:$0xf] }
  0x5b   : > { %v2841_v53 = vor.u32 %v3045_v47, %v2840_v46  ;;  %v2588_v44 = vld [vmem:[%s3686_s29 + $0xf0] sm:$0xf]  ;;  %v2981_v46 = vld [vmem:[%s3686_s29 + $0xf4] sm:$0xf] }
  0x5c   : > { %v3029_v47 = vld [vmem:[%s3686_s29 + $0x274] sm:$0xf] }
  0x5d   : > { %3276 = vmatpush.bf16.msrb.mxu3 %v3057_v16 }
  0x61   : > { %3277 = vmatpush.bf16.msrb.mxu3 %v3056_v19 }
  0x65   : > { %3278 = vmatpush.bf16.msrb.mxu3 %v3055_v22  ;;  %v2816_v22 = vld [vmem:[%s3686_s29 + $0x2b8] sm:$0xf] }
  0x66   : > { %v2817_v29 = vor.u32 %v3039_v24, %v2816_v22 }
  0x68   : > { %1251 = vmatmul.bf16.gmra.mxu0 %v2493_v56  ;;  %1371 = vmatmul.bf16.gmra.mxu3 %v2781_v57  ;;  %v2564_v56 = vld [vmem:[%s3686_s29 + $0xc0] sm:$0xf]  ;;  %v2976_v57 = vld [vmem:[%s3686_s29 + $0xc8] sm:$0xf0] }
  0x69   : > { %3279 = vmatpush.bf16.msra.mxu3 %v3698_v2  ;;  %1420 = vmatmul.bf16.gmra.mxu1 %v2497_v58  ;;  %v2512_v2 = vld [vmem:[%s3686_s29 + $0x50] sm:$0xf]  ;;  %v2975_v58 = vld [vmem:[%s3686_s29 + $0xc4] sm:$0xf]  ;;  %v2565_v0 = vor.u32 %v2976_v57, %v2564_v56  ;;  %v2589_v56 = vor.u32 %v2982_v45, %v2588_v44  ;;  %v2785_v57 = vor.u32 %v3029_v47, %v2782_v48  ;;  %v2988_v47 = vld [vmem:[%s3686_s29 + $0x128] sm:$0xf0] }
  0x6a   : > { %1589 = vmatmul.bf16.gmra.mxu2 %v2501_v59  ;;  %v2513_v7 = vor.u32 %v2962_v3, %v2512_v2  ;;  %v3023_v59 = vld [vmem:[%s3686_s29 + $0x244] sm:$0xf]  ;;  %v2569_v3 = vor.u32 %v2975_v58, %v2566_v61  ;;  %v2597_v61 = vor.u32 %v2983_v51, %v2596_v50  ;;  %v2806_v50 = vld [vmem:[%s3686_s29 + $0x2ac] sm:$0xf0] }
  0x6b   : > { %v2761_v1 = vor.u32 %v3023_v59, %v2758_v60  ;;  %v2593_v60 = vor.u32 %v2981_v46, %v2590_v49  ;;  %v2612_v46 = vld [vmem:[%s3686_s29 + $0x120] sm:$0xf]  ;;  %v2987_v48 = vld [vmem:[%s3686_s29 + $0x124] sm:$0xf]  ;;  %v2614_v51 = vld [vmem:[%s3686_s29 + $0x12c] sm:$0xf0] }
  0x6c   : > { %v3035_v49 = vld [vmem:[%s3686_s29 + $0x2a4] sm:$0xf] }
  0x6d   : > { %3280 = vmatpush.bf16.msra.mxu3 %v3704_v5  ;;  %v2793_v5 = vor.u32 %v3033_v63, %v2792_v62  ;;  %v2572_v62 = vld [vmem:[%s3686_s29 + $0xc8] sm:$0xf]  ;;  %v2977_v63 = vld [vmem:[%s3686_s29 + $0xd0] sm:$0xf0] }
  0x71   : > { %3281 = vmatpush.bf16.msra.mxu3 %v3708_v8  ;;  %v2516_v8 = vld [vmem:[%s3686_s29 + $0x60] sm:$0xf] }
  0x72   : > { %v2517_v16 = vor.u32 %v2964_v9, %v2516_v8 }
  0x75   : > { %3282 = vmatpush.bf16.msra.mxu3 %v3711_v11  ;;  %v3036_v11 = vld [vmem:[%s3686_s29 + $0x2a8] sm:$0xf0] }
  0x78   : > { %1256 = vmatmul.bf16.gmra.mxu0 %v2505_v4  ;;  %1376 = vmatmul.bf16.gmra.mxu3 %v2793_v5  ;;  %v2573_v4 = vor.u32 %v2977_v63, %v2572_v62 }
  0x79   : > { %3283 = vmatpush.bf16.msra.mxu3 %v3714_v14  ;;  %1425 = vmatmul.bf16.gmra.mxu1 %v2509_v6  ;;  %v2524_v14 = vld [vmem:[%s3686_s29 + $0x68] sm:$0xf] }
  0x7a   : > { %1594 = vmatmul.bf16.gmra.mxu2 %v2513_v7  ;;  %v2525_v19 = vor.u32 %v2965_v15, %v2524_v14  ;;  %v2979_v14 = vld [vmem:[%s3686_s29 + $0xe0] sm:$0xf0]  ;;  %v2978_v15 = vld [vmem:[%s3686_s29 + $0xdc] sm:$0xf] }
  0x7d   : > { %3284 = vmatpush.bf16.msra.mxu3 %v3717_v17  ;;  %v2805_v17 = vor.u32 %v3036_v11, %v2804_v10 }
  0x81   : > { %3285 = vmatpush.bf16.msra.mxu3 %v3720_v20  ;;  %v2528_v20 = vld [vmem:[%s3686_s29 + $0x78] sm:$0xf] }
  0x82   : > { %v2529_v28 = vor.u32 %v2967_v21, %v2528_v20  ;;  %v2980_v20 = vld [vmem:[%s3686_s29 + $0xe8] sm:$0xf0] }
  0x85   : > { %3286 = vmatpush.bf16.msra.mxu3 %v3722_v23  ;;  %v2530_v23 = vld [vmem:[%s3686_s29 + $0x84] sm:$0xf0] }
  0x86   : > { %v2533_v30 = vor.u32 %v2966_v25, %v2530_v23  ;;  %v2577_v23 = vor.u32 %v2979_v14, %v2576_v13  ;;  %v2600_v13 = vld [vmem:[%s3686_s29 + $0x108] sm:$0xf]  ;;  %v2985_v14 = vld [vmem:[%s3686_s29 + $0x110] sm:$0xf0] }
  0x88   : > { %1261 = vmatmul.bf16.gmra.mxu0 %v2517_v16  ;;  %1381 = vmatmul.bf16.gmra.mxu3 %v2805_v17  ;;  %v3026_v16 = vld [vmem:[%s3686_s29 + $0x25c] sm:$0xf]  ;;  %v2770_v17 = vld [vmem:[%s3686_s29 + $0x264] sm:$0xf0] }
  0x89   : > { %1430 = vmatmul.bf16.gmra.mxu1 %v2521_v18  ;;  %v2578_v18 = vld [vmem:[%s3686_s29 + $0xe4] sm:$0xf0]  ;;  %v2773_v26 = vor.u32 %v3026_v16, %v2770_v17  ;;  %v3032_v16 = vld [vmem:[%s3686_s29 + $0x28c] sm:$0xf]  ;;  %v2794_v17 = vld [vmem:[%s3686_s29 + $0x294] sm:$0xf0] }
  0x8a   : > { %1599 = vmatmul.bf16.gmra.mxu2 %v2525_v19  ;;  %v2584_v19 = vld [vmem:[%s3686_s29 + $0xe0] sm:$0xf] }
  0x98   : > { %1266 = vmatmul.bf16.gmra.mxu0 %v2529_v28  ;;  %1386 = vmatmul.bf16.gmra.mxu3 %v2817_v29  ;;  %v2581_v29 = vor.u32 %v2978_v15, %v2578_v18  ;;  %v2984_v15 = vld [vmem:[%s3686_s29 + $0x10c] sm:$0xf]  ;;  %v2602_v18 = vld [vmem:[%s3686_s29 + $0x114] sm:$0xf0] }
  0x99   : > { %1435 = vmatmul.bf16.gmra.mxu1 %v2533_v30  ;;  %v2585_v30 = vor.u32 %v2980_v20, %v2584_v19  ;;  %v2608_v19 = vld [vmem:[%s3686_s29 + $0x110] sm:$0xf]  ;;  %v2986_v20 = vld [vmem:[%s3686_s29 + $0x118] sm:$0xf0] }
  0x9a   : > { %1604 = vmatmul.bf16.gmra.mxu2 %v2537_v31 }
  0xa8   : > { %1271 = vmatmul.bf16.gmra.mxu0 %v2541_v40  ;;  %1391 = vmatmul.bf16.gmra.mxu3 %v2829_v41 }
  0xa9   : > { %1440 = vmatmul.bf16.gmra.mxu1 %v2545_v42 }
  0xaa   : > { %1609 = vmatmul.bf16.gmra.mxu2 %v2549_v43 }
  0xb8   : > { %1276 = vmatmul.bf16.gmra.mxu0 %v2553_v52  ;;  %1396 = vmatmul.bf16.gmra.mxu3 %v2841_v53 }
  0xb9   : > { %1445 = vmatmul.bf16.gmra.mxu1 %v2557_v54 }
  0xba   : > { %1614 = vmatmul.bf16.gmra.mxu2 %v2561_v55 }
  0xc5   : > { %v1242_v2 = vpop.f32.mrf.mxu0 }
  0xc6   : > { %v1411_v5 = vpop.f32.mrf.mxu1 }
  0xc7   : > { %v1412_v6 = vadd.f32 %v1411_v5, %v1242_v2 }
  0xc8   : > { %1281 = vmatmul.bf16.gmra.mxu0 %v2565_v0  ;;  %1530 = vmatmul.bf16.vlgmr.msrb.gmra.mxu3 %v2761_v1 }
  0xc9   : > { %1450 = vmatmul.bf16.gmra.mxu1 %v2569_v3 }
  0xca   : > { %1619 = vmatmul.bf16.gmra.mxu2 %v2573_v4 }
  0xcb   : > { %v3808_v7 = vpop.f32.mrf.mxu3 }
  0xcd   : > { %v1580_v8 = vpop.f32.mrf.mxu2  ;;  %v1244_v9 = vpop.f32.mrf.mxu0 }
  0xce   : > { %v1413_v10 = vpop.f32.mrf.mxu1  ;;  %v1581_v11 = vadd.f32 %v1580_v8, %v1412_v6 }
  0xcf   : > { %v1414_v22 = vadd.f32 %v1413_v10, %v1244_v9 }
  0xd0   : > { %v1939_v21 = vadd.f32 %v3810_v12, %v1581_v11 }
  0xd2   : > { %v2067_v32 = vmul.f32 0.1, %v1939_v21  ;;  %vm2003_vm0 = vcmp.ge.f32.partialorder %v1939_v21, 0.0 }
  0xd3   : > { %v3821_v24 = vpop.f32.mrf.mxu3 }
  0xd4   : > { %v2131_v35 = vsel %vm2003_vm0, %v1939_v21, %v2067_v32 }
  0xd5   : > { %v1582_v25 = vpop.f32.mrf.mxu2  ;;  %v1247_v28 = vpop.f32.mrf.mxu0 }
  0xd6   : > { %v1583_v27 = vadd.f32 %v1582_v25, %v1414_v22  ;;  %v1416_v31 = vpop.f32.mrf.mxu1 }
  0xd7   : > { %v1417_v37 = vadd.f32 %v1416_v31, %v1247_v28  ;;  %v2609_v31 = vor.u32 %v2986_v20, %v2608_v19  ;;  %v2990_v19 = vld [vmem:[%s3686_s29 + $0x13c] sm:$0xf] }
  0xd8   : > { %v1940_v33 = vadd.f32 %v3810_v12, %v1583_v27  ;;  %1286 = vmatmul.bf16.gmra.mxu0 %v2577_v23  ;;  %1535 = vmatmul.bf16.gmra.mxu3 %v2773_v26  ;;  %v2601_v26 = vor.u32 %v2985_v14, %v2600_v13  ;;  %v2797_v27 = vor.u32 %v3032_v16, %v2794_v17  ;;  %v2624_v17 = vld [vmem:[%s3686_s29 + $0x138] sm:$0xf]  ;;  %v3038_v20 = vld [vmem:[%s3686_s29 + $0x2bc] sm:$0xf] }
  0xd9   : > { %1455 = vmatmul.bf16.gmra.mxu1 %v2581_v29 }
  0xda   : > { %vm2004_vm1 = vcmp.ge.f32.partialorder %v1940_v33, 0.0  ;;  %v2068_v34 = vmul.f32 0.1, %v1940_v33  ;;  %1624 = vmatmul.bf16.gmra.mxu2 %v2585_v30  ;;  %v2605_v30 = vor.u32 %v2984_v15, %v2602_v18  ;;  %v2991_v18 = vld [vmem:[%s3686_s29 + $0x140] sm:$0xf0] }
  0xdb   : > { %v3825_v38 = vpop.f32.mrf.mxu3 }
  0xdc   : > { %v2132_v36 = vsel %vm2004_vm1, %v1940_v33, %v2068_v34 }
  0xdd   : > { %v3075_v39 = vpack.c.bf16 %v2132_v36, %v2131_v35  ;;  %v1585_v40 = vpop.f32.mrf.mxu2  ;;  %v1249_v41 = vpop.f32.mrf.mxu0 }
  0xde   : > { %v1418_v42 = vpop.f32.mrf.mxu1  ;;  %v1586_v43 = vadd.f32 %v1585_v40, %v1417_v37 }
  0xdf   : > { %3076 = vst [vmem:[%s3827_s22] sm:$0xff] %v3075_v39   ;;  %v1419_v53 = vadd.f32 %v1418_v42, %v1249_v41 }
  0xe0   : > { %v1941_v52 = vadd.f32 %v3810_v12, %v1586_v43 }
  0xe2   : > { %v2069_v63 = vmul.f32 0.1, %v1941_v52  ;;  %vm2005_vm2 = vcmp.ge.f32.partialorder %v1941_v52, 0.0 }
  0xe3   : > { %v3839_v54 = vpop.f32.mrf.mxu3 }
  0xe4   : > { %v2133_v2 = vsel %vm2005_vm2, %v1941_v52, %v2069_v63  ;;  %v2620_v52 = vld [vmem:[%s3686_s29 + $0x128] sm:$0xf]  ;;  %v2617_v63 = vor.u32 %v2987_v48, %v2614_v51 }
  0xe5   : > { %v1587_v55 = vpop.f32.mrf.mxu2  ;;  %v1252_v59 = vpop.f32.mrf.mxu0 }
  0xe6   : > { %v1588_v58 = vadd.f32 %v1587_v55, %v1419_v53  ;;  %v1421_v62 = vpop.f32.mrf.mxu1  ;;  %v2989_v53 = vld [vmem:[%s3686_s29 + $0x130] sm:$0xf0] }
  0xe7   : > { %v1422_v4 = vadd.f32 %v1421_v62, %v1252_v59  ;;  %v2613_v59 = vor.u32 %v2988_v47, %v2612_v46 }
  0xe8   : > { %v1942_v0 = vadd.f32 %v3810_v12, %v1588_v58  ;;  %1291 = vmatmul.bf16.gmra.mxu0 %v2589_v56  ;;  %1540 = vmatmul.bf16.gmra.mxu3 %v2785_v57 }
  0xe9   : > { %1460 = vmatmul.bf16.gmra.mxu1 %v2593_v60  ;;  %v2809_v60 = vor.u32 %v3035_v49, %v2806_v50 }
  0xea   : > { %vm2006_vm3 = vcmp.ge.f32.partialorder %v1942_v0, 0.0  ;;  %v2070_v1 = vmul.f32 0.1, %v1942_v0  ;;  %1629 = vmatmul.bf16.gmra.mxu2 %v2597_v61 }
  0xeb   : > { %v3842_v5 = vpop.f32.mrf.mxu3 }
  0xec   : > { %v2134_v3 = vsel %vm2006_vm3, %v1942_v0, %v2070_v1  ;;  %v2621_v0 = vor.u32 %v2989_v53, %v2620_v52  ;;  %v2636_v52 = vld [vmem:[%s3686_s29 + $0x150] sm:$0xf]  ;;  %v2994_v53 = vld [vmem:[%s3686_s29 + $0x158] sm:$0xf0] }
  0xed   : > { %v3080_v6 = vpack.c.bf16 %v2134_v3, %v2133_v2  ;;  %v1590_v8 = vpop.f32.mrf.mxu2  ;;  %v1254_v9 = vpop.f32.mrf.mxu0 }
  0xee   : > { %v1423_v10 = vpop.f32.mrf.mxu1  ;;  %v1591_v11 = vadd.f32 %v1590_v8, %v1422_v4 }
  0xef   : > { %3232 = vst [vmem:[%s3827_s22 + $0x8] sm:$0xff] %v3080_v6   ;;  %v1424_v22 = vadd.f32 %v1423_v10, %v1254_v9 }
  0xf0   : > { %v1943_v21 = vadd.f32 %v3810_v12, %v1591_v11 }
  0xf2   : > { %v2071_v33 = vmul.f32 0.1, %v1943_v21  ;;  %vm2007_vm4 = vcmp.ge.f32.partialorder %v1943_v21, 0.0 }
  0xf3   : > { %v3854_v25 = vpop.f32.mrf.mxu3 }
  0xf4   : > { %v2135_v36 = vsel %vm2007_vm4, %v1943_v21, %v2071_v33  ;;  %v2818_v21 = vld [vmem:[%s3686_s29 + $0x2c4] sm:$0xf0] }
  0xf5   : > { %v1592_v23 = vpop.f32.mrf.mxu2  ;;  %v1257_v29 = vpop.f32.mrf.mxu0 }
  0xf6   : > { %v1593_v28 = vadd.f32 %v1592_v23, %v1424_v22  ;;  %v1426_v32 = vpop.f32.mrf.mxu1  ;;  %v2626_v22 = vld [vmem:[%s3686_s29 + $0x144] sm:$0xf0]  ;;  %v2632_v23 = vld [vmem:[%s3686_s29 + $0x140] sm:$0xf] }
  0xf7   : > { %v1427_v39 = vadd.f32 %v1426_v32, %v1257_v29  ;;  %v2821_v32 = vor.u32 %v3038_v20, %v2818_v21 }
  0xf8   : > { %v1944_v34 = vadd.f32 %v3810_v12, %v1593_v28  ;;  %1296 = vmatmul.bf16.gmra.mxu0 %v2601_v26  ;;  %1545 = vmatmul.bf16.gmra.mxu3 %v2797_v27  ;;  %v2992_v26 = vld [vmem:[%s3686_s29 + $0x148] sm:$0xf0] }
  0xf9   : > { %1465 = vmatmul.bf16.gmra.mxu1 %v2605_v30 }
  0xfa   : > { %vm2008_vm5 = vcmp.ge.f32.partialorder %v1944_v34, 0.0  ;;  %v2072_v35 = vmul.f32 0.1, %v1944_v34  ;;  %1634 = vmatmul.bf16.gmra.mxu2 %v2609_v31  ;;  %v2625_v31 = vor.u32 %v2991_v18, %v2624_v17 }
  0xfb   : > { %v3857_v40 = vpop.f32.mrf.mxu3 }
  0xfc   : > { %v2136_v37 = vsel %vm2008_vm5, %v1944_v34, %v2072_v35  ;;  %v2629_v35 = vor.u32 %v2990_v19, %v2626_v22 }
  0xfd   : > { %v3085_v41 = vpack.c.bf16 %v2136_v37, %v2135_v36  ;;  %v1595_v42 = vpop.f32.mrf.mxu2  ;;  %v1259_v43 = vpop.f32.mrf.mxu0  ;;  %v2633_v36 = vor.u32 %v2992_v26, %v2632_v23 }
  0xfe   : > { %v1428_v44 = vpop.f32.mrf.mxu1  ;;  %v1596_v45 = vadd.f32 %v1595_v42, %v1427_v39 }
  0xff   : > { %3233 = vst [vmem:[%s3827_s22 + $0x10] sm:$0xff] %v3085_v41   ;;  %v1429_v56 = vadd.f32 %v1428_v44, %v1259_v43 }
 0x100   : > { %v1945_v55 = vadd.f32 %v3810_v12, %v1596_v45 }
 0x102   : > { %v2073_v2 = vmul.f32 0.1, %v1945_v55  ;;  %vm2009_vm6 = vcmp.ge.f32.partialorder %v1945_v55, 0.0 }
 0x103   : > { %v3869_v57 = vpop.f32.mrf.mxu3 }
 0x104   : > { %v2137_v6 = vsel %vm2009_vm6, %v1945_v55, %v2073_v2  ;;  %v2993_v55 = vld [vmem:[%s3686_s29 + $0x154] sm:$0xf]  ;;  %v2637_v2 = vor.u32 %v2994_v53, %v2636_v52 }
 0x105   : > { %v1597_v58 = vpop.f32.mrf.mxu2  ;;  %v1262_v62 = vpop.f32.mrf.mxu0 }
 0x106   : > { %v1598_v61 = vadd.f32 %v1597_v58, %v1429_v56  ;;  %v1431_v1 = vpop.f32.mrf.mxu1  ;;  %v3041_v56 = vld [vmem:[%s3686_s29 + $0x2d4] sm:$0xf]  ;;  %v2830_v58 = vld [vmem:[%s3686_s29 + $0x2dc] sm:$0xf0] }
 0x107   : > { %v1432_v9 = vadd.f32 %v1431_v1, %v1262_v62 }
 0x108   : > { %v1946_v3 = vadd.f32 %v3810_v12, %v1598_v61  ;;  %1301 = vmatmul.bf16.gmra.mxu0 %v2613_v59  ;;  %1550 = vmatmul.bf16.gmra.mxu3 %v2809_v60  ;;  %v2638_v59 = vld [vmem:[%s3686_s29 + $0x15c] sm:$0xf0]  ;;  %v2644_v60 = vld [vmem:[%s3686_s29 + $0x158] sm:$0xf]  ;;  %v2995_v61 = vld [vmem:[%s3686_s29 + $0x160] sm:$0xf0] }
 0x109   : > { %1470 = vmatmul.bf16.gmra.mxu1 %v2617_v63 }
 0x10a   : > { %vm2010_vm7 = vcmp.ge.f32.partialorder %v1946_v3, 0.0  ;;  %v2074_v4 = vmul.f32 0.1, %v1946_v3  ;;  %1639 = vmatmul.bf16.gmra.mxu2 %v2621_v0 }
 0x10b   : > { %v3872_v10 = vpop.f32.mrf.mxu3 }
 0x10c   : > { %v2138_v8 = vsel %vm2010_vm7, %v1946_v3, %v2074_v4  ;;  %v2833_v3 = vor.u32 %v3041_v56, %v2830_v58 }
 0x10d   : > { %v3090_v11 = vpack.c.bf16 %v2138_v8, %v2137_v6  ;;  %v1600_v13 = vpop.f32.mrf.mxu2  ;;  %v1264_v14 = vpop.f32.mrf.mxu0  ;;  %v2641_v8 = vor.u32 %v2993_v55, %v2638_v59 }
 0x10e   : > { %v1433_v15 = vpop.f32.mrf.mxu1  ;;  %v1601_v16 = vadd.f32 %v1600_v13, %v1432_v9  ;;  %v2645_v9 = vor.u32 %v2995_v61, %v2644_v60 }
 0x10f   : > { %3234 = vst [vmem:[%s3827_s22 + $0x18] sm:$0xff] %v3090_v11   ;;  %v1434_v28 = vadd.f32 %v1433_v15, %v1264_v14 }
 0x110   : > { %v1947_v27 = vadd.f32 %v3810_v12, %v1601_v16 }
 0x112   : > { %v2075_v39 = vmul.f32 0.1, %v1947_v27  ;;  %vm2011_vm8 = vcmp.ge.f32.partialorder %v1947_v27, 0.0 }
 0x113   : > { %v3884_v29 = vpop.f32.mrf.mxu3 }
 0x114   : > { %v2139_v43 = vsel %vm2011_vm8, %v1947_v27, %v2075_v39  ;;  %v2648_v27 = vld [vmem:[%s3686_s29 + $0x168] sm:$0xf] }
 0x115   : > { %v1602_v30 = vpop.f32.mrf.mxu2  ;;  %v1267_v34 = vpop.f32.mrf.mxu0 }
 0x116   : > { %v1603_v33 = vadd.f32 %v1602_v30, %v1434_v28  ;;  %v1436_v37 = vpop.f32.mrf.mxu1  ;;  %v2997_v28 = vld [vmem:[%s3686_s29 + $0x170] sm:$0xf0]  ;;  %v2996_v30 = vld [vmem:[%s3686_s29 + $0x16c] sm:$0xf] }
 0x117   : > { %v1437_v45 = vadd.f32 %v1436_v37, %v1267_v34  ;;  %v2656_v34 = vld [vmem:[%s3686_s29 + $0x170] sm:$0xf] }
 0x118   : > { %v1948_v41 = vadd.f32 %v3810_v12, %v1603_v33  ;;  %1306 = vmatmul.bf16.gmra.mxu0 %v2625_v31  ;;  %1555 = vmatmul.bf16.gmra.mxu3 %v2821_v32  ;;  %v3044_v31 = vld [vmem:[%s3686_s29 + $0x2ec] sm:$0xf]  ;;  %v2842_v32 = vld [vmem:[%s3686_s29 + $0x2f4] sm:$0xf0] }
 0x119   : > { %1475 = vmatmul.bf16.gmra.mxu1 %v2629_v35  ;;  %v2650_v33 = vld [vmem:[%s3686_s29 + $0x174] sm:$0xf0]  ;;  %v2998_v35 = vld [vmem:[%s3686_s29 + $0x178] sm:$0xf0] }
 0x11a   : > { %vm2012_vm9 = vcmp.ge.f32.partialorder %v1948_v41, 0.0  ;;  %v2076_v42 = vmul.f32 0.1, %v1948_v41  ;;  %1644 = vmatmul.bf16.gmra.mxu2 %v2633_v36 }
 0x11b   : > { %v3887_v46 = vpop.f32.mrf.mxu3 }
 0x11c   : > { %v2140_v44 = vsel %vm2012_vm9, %v1948_v41, %v2076_v42  ;;  %v2649_v42 = vor.u32 %v2997_v28, %v2648_v27 }
 0x11d   : > { %v3095_v47 = vpack.c.bf16 %v2140_v44, %v2139_v43  ;;  %v1605_v48 = vpop.f32.mrf.mxu2  ;;  %v1269_v49 = vpop.f32.mrf.mxu0  ;;  %v2845_v43 = vor.u32 %v3044_v31, %v2842_v32 }
 0x11e   : > { %v1438_v50 = vpop.f32.mrf.mxu1  ;;  %v1606_v51 = vadd.f32 %v1605_v48, %v1437_v45  ;;  %v2657_v48 = vor.u32 %v2998_v35, %v2656_v34 }
 0x11f   : > { %3235 = vst [vmem:[%s3827_s22 + $0x20] sm:$0xff] %v3095_v47   ;;  %v1439_v63 = vadd.f32 %v1438_v50, %v1269_v49  ;;  %v2653_v47 = vor.u32 %v2996_v30, %v2650_v33 }
 0x120   : > { %v1949_v62 = vadd.f32 %v3810_v12, %v1606_v51 }
 0x122   : > { %v2077_v13 = vmul.f32 0.1, %v1949_v62  ;;  %vm2013_vm10 = vcmp.ge.f32.partialorder %v1949_v62, 0.0 }
 0x123   : > { %v3899_v0 = vpop.f32.mrf.mxu3 }
 0x124   : > { %v2141_v16 = vsel %vm2013_vm10, %v1949_v62, %v2077_v13 }
 0x125   : > { %v1607_v1 = vpop.f32.mrf.mxu2  ;;  %v1272_v6 = vpop.f32.mrf.mxu0 }
 0x126   : > { %v1608_v4 = vadd.f32 %v1607_v1, %v1439_v63  ;;  %v1441_v11 = vpop.f32.mrf.mxu1  ;;  %v2660_v1 = vld [vmem:[%s3686_s29 + $0x180] sm:$0xf] }
 0x127   : > { %v1442_v18 = vadd.f32 %v1441_v11, %v1272_v6  ;;  %v3025_v6 = vld [vmem:[%s3686_s29 + $0x250] sm:$0xf0] }
 0x128   : > { %v1950_v14 = vadd.f32 %v3810_v12, %v1608_v4  ;;  %1311 = vmatmul.bf16.gmra.mxu0 %v2637_v2  ;;  %1560 = vmatmul.bf16.gmra.mxu3 %v2833_v3  ;;  %v3000_v2 = vld [vmem:[%s3686_s29 + $0x188] sm:$0xf0]  ;;  %v2999_v3 = vld [vmem:[%s3686_s29 + $0x184] sm:$0xf]  ;;  %v2764_v4 = vld [vmem:[%s3686_s29 + $0x248] sm:$0xf] }
 0x129   : > { %1480 = vmatmul.bf16.gmra.mxu1 %v2641_v8  ;;  %v2662_v8 = vld [vmem:[%s3686_s29 + $0x18c] sm:$0xf0]  ;;  %v3001_v11 = vld [vmem:[%s3686_s29 + $0x190] sm:$0xf0] }
 0x12a   : > { %vm2014_vm11 = vcmp.ge.f32.partialorder %v1950_v14, 0.0  ;;  %v2078_v15 = vmul.f32 0.1, %v1950_v14  ;;  %1649 = vmatmul.bf16.gmra.mxu2 %v2645_v9  ;;  %v2668_v9 = vld [vmem:[%s3686_s29 + $0x188] sm:$0xf] }
 0x12b   : > { %v3902_v19 = vpop.f32.mrf.mxu3 }
 0x12c   : > { %v2142_v17 = vsel %vm2014_vm11, %v1950_v14, %v2078_v15 }
 0x12d   : > { %v3100_v20 = vpack.c.bf16 %v2142_v17, %v2141_v16  ;;  %v1610_v21 = vpop.f32.mrf.mxu2  ;;  %v1274_v22 = vpop.f32.mrf.mxu0  ;;  %v2661_v17 = vor.u32 %v3000_v2, %v2660_v1 }
 0x12e   : > { %v1443_v23 = vpop.f32.mrf.mxu1  ;;  %v1611_v26 = vadd.f32 %v1610_v21, %v1442_v18  ;;  %v2765_v18 = vor.u32 %v3025_v6, %v2764_v4 }
 0x12f   : > { %3236 = vst [vmem:[%s3827_s22 + $0x28] sm:$0xff] %v3100_v20   ;;  %v1444_v37 = vadd.f32 %v1443_v23, %v1274_v22  ;;  %v2665_v22 = vor.u32 %v2999_v3, %v2662_v8  ;;  %v2669_v23 = vor.u32 %v3001_v11, %v2668_v9 }
 0x130   : > { %v1951_v36 = vadd.f32 %v3810_v12, %v1611_v26 }
 0x132   : > { %v2079_v50 = vmul.f32 0.1, %v1951_v36  ;;  %vm2015_vm12 = vcmp.ge.f32.partialorder %v1951_v36, 0.0 }
 0x133   : > { %v3914_v39 = vpop.f32.mrf.mxu3 }
 0x134   : > { %v2143_v53 = vsel %vm2015_vm12, %v1951_v36, %v2079_v50  ;;  %v2680_v50 = vld [vmem:[%s3686_s29 + $0x1a0] sm:$0xf] }
 0x135   : > { %v1612_v41 = vpop.f32.mrf.mxu2  ;;  %v1277_v45 = vpop.f32.mrf.mxu0 }
 0x136   : > { %v1613_v44 = vadd.f32 %v1612_v41, %v1444_v37  ;;  %v1446_v49 = vpop.f32.mrf.mxu1 }
 0x137   : > { %v1447_v56 = vadd.f32 %v1446_v49, %v1277_v45  ;;  %v3002_v45 = vld [vmem:[%s3686_s29 + $0x19c] sm:$0xf]  ;;  %v2674_v49 = vld [vmem:[%s3686_s29 + $0x1a4] sm:$0xf0] }
 0x138   : > { %v1952_v51 = vadd.f32 %v3810_v12, %v1613_v44  ;;  %1316 = vmatmul.bf16.gmra.mxu0 %v2649_v42  ;;  %1565 = vmatmul.bf16.gmra.mxu3 %v2845_v43  ;;  %v2672_v43 = vld [vmem:[%s3686_s29 + $0x198] sm:$0xf]  ;;  %v3003_v44 = vld [vmem:[%s3686_s29 + $0x1a0] sm:$0xf0] }
 0x139   : > { %1485 = vmatmul.bf16.gmra.mxu1 %v2653_v47  ;;  %v2776_v47 = vld [vmem:[%s3686_s29 + $0x260] sm:$0xf] }
 0x13a   : > { %vm2016_vm13 = vcmp.ge.f32.partialorder %v1952_v51, 0.0  ;;  %v2080_v52 = vmul.f32 0.1, %v1952_v51  ;;  %1654 = vmatmul.bf16.gmra.mxu2 %v2657_v48  ;;  %v3028_v48 = vld [vmem:[%s3686_s29 + $0x268] sm:$0xf0] }
 0x13b   : > { %v3917_v58 = vpop.f32.mrf.mxu3 }
 0x13c   : > { %v2144_v55 = vsel %vm2016_vm13, %v1952_v51, %v2080_v52  ;;  %v3004_v51 = vld [vmem:[%s3686_s29 + $0x1a8] sm:$0xf0] }
 0x13d   : > { %v3105_v59 = vpack.c.bf16 %v2144_v55, %v2143_v53  ;;  %v1615_v60 = vpop.f32.mrf.mxu2  ;;  %v1279_v61 = vpop.f32.mrf.mxu0  ;;  %v2681_v1 = vor.u32 %v3004_v51, %v2680_v50 }
 0x13e   : > { %v1448_v62 = vpop.f32.mrf.mxu1  ;;  %v1616_v63 = vadd.f32 %v1615_v60, %v1447_v56  ;;  %v2777_v60 = vor.u32 %v3028_v48, %v2776_v47 }
 0x13f   : > { %3237 = vst [vmem:[%s3827_s22 + $0x30] sm:$0xff] %v3105_v59   ;;  %v1449_v14 = vadd.f32 %v1448_v62, %v1279_v61  ;;  %v2673_v59 = vor.u32 %v3003_v44, %v2672_v43 }
 0x140   : > { %v1953_v13 = vadd.f32 %v3810_v12, %v1616_v63  ;;  %v2677_v63 = vor.u32 %v3002_v45, %v2674_v49 }
 0x142   : > { %v2081_v27 = vmul.f32 0.1, %v1953_v13  ;;  %vm2017_vm14 = vcmp.ge.f32.partialorder %v1953_v13, 0.0 }
 0x143   : > { %v3929_v15 = vpop.f32.mrf.mxu3 }
 0x144   : > { %v2145_v31 = vsel %vm2017_vm14, %v1953_v13, %v2081_v27  ;;  %v3031_v27 = vld [vmem:[%s3686_s29 + $0x280] sm:$0xf0] }
 0x145   : > { %v1617_v16 = vpop.f32.mrf.mxu2  ;;  %v1282_v21 = vpop.f32.mrf.mxu0 }
 0x146   : > { %v1618_v20 = vadd.f32 %v1617_v16, %v1449_v14  ;;  %v1451_v26 = vpop.f32.mrf.mxu1 }
 0x147   : > { %v1452_v33 = vadd.f32 %v1451_v26, %v1282_v21  ;;  %v2684_v21 = vld [vmem:[%s3686_s29 + $0x1b0] sm:$0xf]  ;;  %v2788_v26 = vld [vmem:[%s3686_s29 + $0x278] sm:$0xf] }
 0x148   : > { %v1954_v28 = vadd.f32 %v3810_v12, %v1618_v20  ;;  %1321 = vmatmul.bf16.gmra.mxu0 %v2661_v17  ;;  %1699 = vmatmul.bf16.vlgmr.msra.gmra.mxu3 %v2765_v18 }
 0x149   : > { %1490 = vmatmul.bf16.gmra.mxu1 %v2665_v22  ;;  %v3006_v22 = vld [vmem:[%s3686_s29 + $0x1b8] sm:$0xf0] }
 0x14a   : > { %vm2018_vm15 = vcmp.ge.f32.partialorder %v1954_v28, 0.0  ;;  %v2082_v30 = vmul.f32 0.1, %v1954_v28  ;;  %1659 = vmatmul.bf16.gmra.mxu2 %v2669_v23  ;;  %v3005_v23 = vld [vmem:[%s3686_s29 + $0x1b4] sm:$0xf] }
 0x14b   : > { %v3932_v34 = vpop.f32.mrf.mxu3 }
 0x14c   : > { %v2146_v32 = vsel %vm2018_vm15, %v1954_v28, %v2082_v30  ;;  %v2686_v28 = vld [vmem:[%s3686_s29 + $0x1bc] sm:$0xf0]  ;;  %v2692_v30 = vld [vmem:[%s3686_s29 + $0x1b8] sm:$0xf] }
 0x14d   : > { %v3110_v35 = vpack.c.bf16 %v2146_v32, %v2145_v31  ;;  %v1620_v36 = vpop.f32.mrf.mxu2  ;;  %v1284_v37 = vpop.f32.mrf.mxu0  ;;  %v3007_v31 = vld [vmem:[%s3686_s29 + $0x1c0] sm:$0xf0]  ;;  %v2689_v44 = vor.u32 %v3005_v23, %v2686_v28 }
 0x14e   : > { %v1453_v41 = vpop.f32.mrf.mxu1  ;;  %v1621_v42 = vadd.f32 %v1620_v36, %v1452_v33  ;;  %v2693_v45 = vor.u32 %v3007_v31, %v2692_v30 }
 0x14f   : > { %3238 = vst [vmem:[%s3827_s22 + $0x38] sm:$0xff] %v3110_v35   ;;  %v1454_v53 = vadd.f32 %v1453_v41, %v1284_v37  ;;  %v2685_v37 = vor.u32 %v3006_v22, %v2684_v21  ;;  %v2789_v41 = vor.u32 %v3031_v27, %v2788_v26 }
 0x150   : > { %v1955_v52 = vadd.f32 %v3810_v12, %v1621_v42 }
 0x152   : > { %v2083_v3 = vmul.f32 0.1, %v1955_v52  ;;  %vm2019_vm0 = vcmp.ge.f32.partialorder %v1955_v52, 0.0 }
 0x153   : > { %v3944_v55 = vpop.f32.mrf.mxu3 }
 0x154   : > { %v2147_v8 = vsel %vm2019_vm0, %v1955_v52, %v2083_v3  ;;  %v3008_v3 = vld [vmem:[%s3686_s29 + $0x1cc] sm:$0xf] }
 0x155   : > { %v1622_v56 = vpop.f32.mrf.mxu2  ;;  %v1287_v62 = vpop.f32.mrf.mxu0 }
 0x156   : > { %v1623_v61 = vadd.f32 %v1622_v56, %v1454_v53  ;;  %v1456_v2 = vpop.f32.mrf.mxu1 }
 0x157   : > { %v1457_v11 = vadd.f32 %v1456_v2, %v1287_v62  ;;  %v3009_v2 = vld [vmem:[%s3686_s29 + $0x1d0] sm:$0xf0] }
 0x158   : > { %v1956_v4 = vadd.f32 %v3810_v12, %v1623_v61  ;;  %1326 = vmatmul.bf16.gmra.mxu0 %v2673_v59  ;;  %1704 = vmatmul.bf16.gmra.mxu3 %v2777_v60 }
 0x159   : > { %1495 = vmatmul.bf16.gmra.mxu1 %v2677_v63 }
 0x15a   : > { %vm2020_vm1 = vcmp.ge.f32.partialorder %v1956_v4, 0.0  ;;  %v2084_v6 = vmul.f32 0.1, %v1956_v4  ;;  %1664 = vmatmul.bf16.gmra.mxu2 %v2681_v1  ;;  %v2696_v1 = vld [vmem:[%s3686_s29 + $0x1c8] sm:$0xf] }
 0x15b   : > { %v3947_v13 = vpop.f32.mrf.mxu3 }
 0x15c   : > { %v2148_v9 = vsel %vm2020_vm1, %v1956_v4, %v2084_v6  ;;  %v2800_v4 = vld [vmem:[%s3686_s29 + $0x290] sm:$0xf]  ;;  %v3034_v6 = vld [vmem:[%s3686_s29 + $0x298] sm:$0xf0] }
 0x15d   : > { %v3115_v14 = vpack.c.bf16 %v2148_v9, %v2147_v8  ;;  %v1625_v16 = vpop.f32.mrf.mxu2  ;;  %v1289_v17 = vpop.f32.mrf.mxu0  ;;  %v2698_v8 = vld [vmem:[%s3686_s29 + $0x1d4] sm:$0xf0]  ;;  %v2704_v9 = vld [vmem:[%s3686_s29 + $0x1d0] sm:$0xf]  ;;  %v2801_v21 = vor.u32 %v3034_v6, %v2800_v4 }
 0x15e   : > { %v1458_v18 = vpop.f32.mrf.mxu1  ;;  %v1626_v20 = vadd.f32 %v1625_v16, %v1457_v11  ;;  %v3010_v11 = vld [vmem:[%s3686_s29 + $0x1d8] sm:$0xf0]  ;;  %v2701_v26 = vor.u32 %v3008_v3, %v2698_v8 }
 0x15f   : > { %3239 = vst [vmem:[%s3827_s22 + $0x40] sm:$0xff] %v3115_v14   ;;  %v1459_v33 = vadd.f32 %v1458_v18, %v1289_v17  ;;  %v2705_v27 = vor.u32 %v3010_v11, %v2704_v9 }
 0x160   : > { %v1957_v32 = vadd.f32 %v3810_v12, %v1626_v20  ;;  %v2697_v20 = vor.u32 %v3009_v2, %v2696_v1 }
 0x162   : > { %v2085_v48 = vmul.f32 0.1, %v1957_v32  ;;  %vm2021_vm2 = vcmp.ge.f32.partialorder %v1957_v32, 0.0 }
 0x163   : > { %v3959_v35 = vpop.f32.mrf.mxu3 }
 0x164   : > { %v2149_v51 = vsel %vm2021_vm2, %v1957_v32, %v2085_v48  ;;  %v2708_v48 = vld [vmem:[%s3686_s29 + $0x1e0] sm:$0xf] }
 0x165   : > { %v1627_v36 = vpop.f32.mrf.mxu2  ;;  %v1292_v43 = vpop.f32.mrf.mxu0 }
 0x166   : > { %v1628_v42 = vadd.f32 %v1627_v36, %v1459_v33  ;;  %v1461_v47 = vpop.f32.mrf.mxu1 }
 0x167   : > { %v1462_v53 = vadd.f32 %v1461_v47, %v1292_v43 }
 0x168   : > { %v1958_v49 = vadd.f32 %v3810_v12, %v1628_v42  ;;  %1331 = vmatmul.bf16.gmra.mxu0 %v2685_v37  ;;  %1709 = vmatmul.bf16.gmra.mxu3 %v2789_v41 }
 0x169   : > { %1500 = vmatmul.bf16.gmra.mxu1 %v2689_v44 }
 0x16a   : > { %vm2022_vm3 = vcmp.ge.f32.partialorder %v1958_v49, 0.0  ;;  %v2086_v50 = vmul.f32 0.1, %v1958_v49  ;;  %1669 = vmatmul.bf16.gmra.mxu2 %v2693_v45 }
 0x16b   : > { %v3962_v56 = vpop.f32.mrf.mxu3 }
 0x16c   : > { %v2150_v52 = vsel %vm2022_vm3, %v1958_v49, %v2086_v50  ;;  %v3012_v49 = vld [vmem:[%s3686_s29 + $0x1e8] sm:$0xf0]  ;;  %v3011_v50 = vld [vmem:[%s3686_s29 + $0x1e4] sm:$0xf] }
 0x16d   : > { %v3120_v59 = vpack.c.bf16 %v2150_v52, %v2149_v51  ;;  %v1630_v60 = vpop.f32.mrf.mxu2  ;;  %v1294_v61 = vpop.f32.mrf.mxu0  ;;  %v2812_v51 = vld [vmem:[%s3686_s29 + $0x2a8] sm:$0xf]  ;;  %v3037_v52 = vld [vmem:[%s3686_s29 + $0x2b0] sm:$0xf0]  ;;  %v2709_v2 = vor.u32 %v3012_v49, %v2708_v48 }
 0x16e   : > { %v1463_v62 = vpop.f32.mrf.mxu1  ;;  %v1631_v63 = vadd.f32 %v1630_v60, %v1462_v53  ;;  %v2710_v53 = vld [vmem:[%s3686_s29 + $0x1ec] sm:$0xf0]  ;;  %v3013_v60 = vld [vmem:[%s3686_s29 + $0x1f0] sm:$0xf0]  ;;  %v2813_v3 = vor.u32 %v3037_v52, %v2812_v51 }
 0x16f   : > { %3240 = vst [vmem:[%s3827_s22 + $0x48] sm:$0xff] %v3120_v59   ;;  %v1464_v16 = vadd.f32 %v1463_v62, %v1294_v61  ;;  %v2716_v59 = vld [vmem:[%s3686_s29 + $0x1e8] sm:$0xf]  ;;  %v2713_v8 = vor.u32 %v3011_v50, %v2710_v53 }
 0x170   : > { %v1959_v14 = vadd.f32 %v3810_v12, %v1631_v63  ;;  %v2717_v9 = vor.u32 %v3013_v60, %v2716_v59 }
 0x172   : > { %v2087_v30 = vmul.f32 0.1, %v1959_v14  ;;  %vm2023_vm4 = vcmp.ge.f32.partialorder %v1959_v14, 0.0 }
 0x173   : > { %v3974_v17 = vpop.f32.mrf.mxu3 }
 0x174   : > { %v2151_v33 = vsel %vm2023_vm4, %v1959_v14, %v2087_v30 }
 0x175   : > { %v1632_v18 = vpop.f32.mrf.mxu2  ;;  %v1297_v23 = vpop.f32.mrf.mxu0 }
 0x176   : > { %v1633_v22 = vadd.f32 %v1632_v18, %v1464_v16  ;;  %v1466_v28 = vpop.f32.mrf.mxu1 }
 0x177   : > { %v1467_v37 = vadd.f32 %v1466_v28, %v1297_v23 }
 0x178   : > { %v1960_v31 = vadd.f32 %v3810_v12, %v1633_v22  ;;  %1336 = vmatmul.bf16.gmra.mxu0 %v2697_v20  ;;  %1714 = vmatmul.bf16.gmra.mxu3 %v2801_v21 }
 0x179   : > { %1505 = vmatmul.bf16.gmra.mxu1 %v2701_v26 }
 0x17a   : > { %vm2024_vm5 = vcmp.ge.f32.partialorder %v1960_v31, 0.0  ;;  %v2088_v32 = vmul.f32 0.1, %v1960_v31  ;;  %1674 = vmatmul.bf16.gmra.mxu2 %v2705_v27 }
 0x17b   : > { %v3977_v41 = vpop.f32.mrf.mxu3 }
 0x17c   : > { %v2152_v36 = vsel %vm2024_vm5, %v1960_v31, %v2088_v32  ;;  %v2720_v32 = vld [vmem:[%s3686_s29 + $0x1f8] sm:$0xf] }
 0x17d   : > { %v3125_v42 = vpack.c.bf16 %v2152_v36, %v2151_v33  ;;  %v1635_v43 = vpop.f32.mrf.mxu2  ;;  %v1299_v44 = vpop.f32.mrf.mxu0  ;;  %v3015_v33 = vld [vmem:[%s3686_s29 + $0x200] sm:$0xf0]  ;;  %v3014_v36 = vld [vmem:[%s3686_s29 + $0x1fc] sm:$0xf] }
 0x17e   : > { %v1468_v45 = vpop.f32.mrf.mxu1  ;;  %v1636_v47 = vadd.f32 %v1635_v43, %v1467_v37  ;;  %v2824_v37 = vld [vmem:[%s3686_s29 + $0x2c0] sm:$0xf]  ;;  %v2722_v43 = vld [vmem:[%s3686_s29 + $0x204] sm:$0xf0]  ;;  %v2721_v51 = vor.u32 %v3015_v33, %v2720_v32  ;;  %v3019_v32 = vld [vmem:[%s3686_s29 + $0x220] sm:$0xf0] }
 0x17f   : > { %3241 = vst [vmem:[%s3827_s22 + $0x50] sm:$0xff] %v3125_v42   ;;  %v1469_v62 = vadd.f32 %v1468_v45, %v1299_v44  ;;  %v3040_v42 = vld [vmem:[%s3686_s29 + $0x2c8] sm:$0xf0]  ;;  %v2728_v44 = vld [vmem:[%s3686_s29 + $0x200] sm:$0xf]  ;;  %v2725_v60 = vor.u32 %v3014_v36, %v2722_v43 }
 0x180   : > { %v1961_v61 = vadd.f32 %v3810_v12, %v1636_v47  ;;  %v3016_v45 = vld [vmem:[%s3686_s29 + $0x208] sm:$0xf0]  ;;  %v2825_v52 = vor.u32 %v3040_v42, %v2824_v37 }
 0x182   : > { %v2089_v14 = vmul.f32 0.1, %v1961_v61  ;;  %vm2025_vm6 = vcmp.ge.f32.partialorder %v1961_v61, 0.0 }
 0x183   : > { %v3989_v63 = vpop.f32.mrf.mxu3 }
 0x184   : > { %v2153_v20 = vsel %vm2025_vm6, %v1961_v61, %v2089_v14  ;;  %v2729_v61 = vor.u32 %v3016_v45, %v2728_v44 }
 0x185   : > { %v1637_v1 = vpop.f32.mrf.mxu2  ;;  %v1302_v6 = vpop.f32.mrf.mxu0 }
 0x186   : > { %v1638_v4 = vadd.f32 %v1637_v1, %v1469_v62  ;;  %v1471_v11 = vpop.f32.mrf.mxu1 }
 0x187   : > { %v1472_v22 = vadd.f32 %v1471_v11, %v1302_v6 }
 0x188   : > { %v1962_v16 = vadd.f32 %v3810_v12, %v1638_v4  ;;  %1341 = vmatmul.bf16.gmra.mxu0 %v2709_v2  ;;  %1719 = vmatmul.bf16.gmra.mxu3 %v2813_v3 }
 0x189   : > { %1510 = vmatmul.bf16.gmra.mxu1 %v2713_v8 }
 0x18a   : > { %vm2026_vm7 = vcmp.ge.f32.partialorder %v1962_v16, 0.0  ;;  %v2090_v18 = vmul.f32 0.1, %v1962_v16  ;;  %1679 = vmatmul.bf16.gmra.mxu2 %v2717_v9 }
 0x18b   : > { %v3992_v23 = vpop.f32.mrf.mxu3 }
 0x18c   : > { %v2154_v21 = vsel %vm2026_vm7, %v1962_v16, %v2090_v18 }
 0x18d   : > { %v3130_v26 = vpack.c.bf16 %v2154_v21, %v2153_v20  ;;  %v1640_v27 = vpop.f32.mrf.mxu2  ;;  %v1304_v28 = vpop.f32.mrf.mxu0  ;;  %v2732_v21 = vld [vmem:[%s3686_s29 + $0x210] sm:$0xf] }
 0x18e   : > { %v1473_v30 = vpop.f32.mrf.mxu1  ;;  %v1641_v31 = vadd.f32 %v1640_v27, %v1472_v22  ;;  %v3018_v22 = vld [vmem:[%s3686_s29 + $0x218] sm:$0xf0]  ;;  %v2836_v27 = vld [vmem:[%s3686_s29 + $0x2d8] sm:$0xf] }
 0x18f   : > { %3242 = vst [vmem:[%s3827_s22 + $0x58] sm:$0xff] %v3130_v26   ;;  %v1474_v48 = vadd.f32 %v1473_v30, %v1304_v28  ;;  %v3017_v26 = vld [vmem:[%s3686_s29 + $0x214] sm:$0xf]  ;;  %v3043_v28 = vld [vmem:[%s3686_s29 + $0x2e0] sm:$0xf0]  ;;  %v2733_v43 = vor.u32 %v3018_v22, %v2732_v21 }
 0x190   : > { %v1963_v47 = vadd.f32 %v3810_v12, %v1641_v31  ;;  %v2734_v30 = vld [vmem:[%s3686_s29 + $0x21c] sm:$0xf0]  ;;  %v2740_v31 = vld [vmem:[%s3686_s29 + $0x218] sm:$0xf]  ;;  %v2837_v44 = vor.u32 %v3043_v28, %v2836_v27  ;;  %v2752_v22 = vld [vmem:[%s3686_s29 + $0x230] sm:$0xf] }
 0x191   : > { %v2746_v21 = vld [vmem:[%s3686_s29 + $0x234] sm:$0xf0] }
 0x192   : > { %v2091_v1 = vmul.f32 0.1, %v1963_v47  ;;  %vm2027_vm8 = vcmp.ge.f32.partialorder %v1963_v47, 0.0 }
 0x193   : > { %v4004_v49 = vpop.f32.mrf.mxu3 }
 0x194   : > { %v2155_v4 = vsel %vm2027_vm8, %v1963_v47, %v2091_v1 }
 0x195   : > { %v1642_v50 = vpop.f32.mrf.mxu2  ;;  %v1307_v59 = vpop.f32.mrf.mxu0 }
 0x196   : > { %v1643_v53 = vadd.f32 %v1642_v50, %v1474_v48  ;;  %v1476_v62 = vpop.f32.mrf.mxu1  ;;  %v2737_v48 = vor.u32 %v3017_v26, %v2734_v30  ;;  %v2741_v50 = vor.u32 %v3019_v32, %v2740_v31  ;;  %v3022_v26 = vld [vmem:[%s3686_s29 + $0x238] sm:$0xf0] }
 0x197   : > { %v1477_v8 = vadd.f32 %v1476_v62, %v1307_v59 }
 0x198   : > { %v1964_v2 = vadd.f32 %v3810_v12, %v1643_v53  ;;  %1346 = vmatmul.bf16.gmra.mxu0 %v2721_v51  ;;  %1724 = vmatmul.bf16.gmra.mxu3 %v2825_v52  ;;  %v4021_v53 = vld [vmem:[#allocation8] ss:$0 sm:$0xff] }
 0x199   : > { %1515 = vmatmul.bf16.gmra.mxu1 %v2725_v60 }
 0x19a   : > { %vm2028_vm9 = vcmp.ge.f32.partialorder %v1964_v2, 0.0  ;;  %v2092_v3 = vmul.f32 0.1, %v1964_v2  ;;  %1684 = vmatmul.bf16.gmra.mxu2 %v2729_v61 }
 0x19b   : > { %v4007_v9 = vpop.f32.mrf.mxu3 }
 0x19c   : > { %v2156_v6 = vsel %vm2028_vm9, %v1964_v2, %v2092_v3 }
 0x19d   : > { %v3135_v11 = vpack.c.bf16 %v2156_v6, %v2155_v4  ;;  %v1645_v14 = vpop.f32.mrf.mxu2  ;;  %v1309_v16 = vpop.f32.mrf.mxu0 }
 0x19e   : > { %v1478_v18 = vpop.f32.mrf.mxu1  ;;  %v1646_v20 = vadd.f32 %v1645_v14, %v1477_v8  ;;  %v3021_v14 = vld [vmem:[%s3686_s29 + $0x230] sm:$0xf0] }
 0x19f   : > { %3243 = vst [vmem:[%s3827_s22 + $0x60] sm:$0xff] %v3135_v11   ;;  %v1479_v36 = vadd.f32 %v1478_v18, %v1309_v16  ;;  %v2744_v11 = vld [vmem:[%s3686_s29 + $0x228] sm:$0xf]  ;;  %v3020_v16 = vld [vmem:[%s3686_s29 + $0x22c] sm:$0xf] }
 0x1a0   : > { %v1965_v33 = vadd.f32 %v3810_v12, %v1646_v20  ;;  %v2848_v18 = vld [vmem:[%s3686_s29 + $0x2f0] sm:$0xf]  ;;  %v3046_v20 = vld [vmem:[%s3686_s29 + $0x2f8] sm:$0xf0]  ;;  %v2745_v32 = vor.u32 %v3021_v14, %v2744_v11 }
 0x1a2   : > { %v2093_v52 = vmul.f32 0.1, %v1965_v33  ;;  %vm2029_vm10 = vcmp.ge.f32.partialorder %v1965_v33, 0.0 }
 0x1a3   : > { %v4019_v37 = vpop.f32.mrf.mxu3 }
 0x1a4   : > { %v2157_v60 = vsel %vm2029_vm10, %v1965_v33, %v2093_v52  ;;  %v2849_v33 = vor.u32 %v3046_v20, %v2848_v18 }
 0x1a5   : > { %v1647_v42 = vpop.f32.mrf.mxu2  ;;  %v1312_v47 = vpop.f32.mrf.mxu0 }
 0x1a6   : > { %v1648_v45 = vadd.f32 %v1647_v42, %v1479_v36  ;;  %v1481_v51 = vpop.f32.mrf.mxu1 }
 0x1a7   : > { %v1482_v62 = vadd.f32 %v1481_v51, %v1312_v47 }
 0x1a8   : > { %v1966_v59 = vadd.f32 %v4021_v53, %v1648_v45  ;;  %1351 = vmatmul.bf16.gmra.mxu0 %v2733_v43  ;;  %1729 = vmatmul.bf16.gmra.mxu3 %v2837_v44  ;;  %v2749_v43 = vor.u32 %v3020_v16, %v2746_v21  ;;  %v2753_v44 = vor.u32 %v3022_v26, %v2752_v22 }
 0x1a9   : > { %1520 = vmatmul.bf16.gmra.mxu1 %v2737_v48 }
 0x1aa   : > { %vm2030_vm11 = vcmp.ge.f32.partialorder %v1966_v59, 0.0  ;;  %v2094_v12 = vmul.f32 0.1, %v1966_v59  ;;  %1689 = vmatmul.bf16.gmra.mxu2 %v2741_v50 }
 0x1ab   : > { %v4024_v1 = vpop.f32.mrf.mxu3 }
 0x1ac   : > { %v2158_v61 = vsel %vm2030_vm11, %v1966_v59, %v2094_v12 }
 0x1ad   : > { %v3140_v2 = vpack.c.bf16 %v2158_v61, %v2157_v60  ;;  %v1650_v3 = vpop.f32.mrf.mxu2  ;;  %v1314_v4 = vpop.f32.mrf.mxu0 }
 0x1ae   : > { %v1483_v6 = vpop.f32.mrf.mxu1  ;;  %v1651_v8 = vadd.f32 %v1650_v3, %v1482_v62 }
 0x1af   : > { %3244 = vst [vmem:[%s3827_s22 + $0x68] sm:$0xff] %v3140_v2   ;;  %v1484_v28 = vadd.f32 %v1483_v6, %v1314_v4 }
 0x1b0   : > { %v1967_v27 = vadd.f32 %v4021_v53, %v1651_v8 }
 0x1b2   : > { %v2095_v47 = vmul.f32 0.1, %v1967_v27  ;;  %vm2031_vm12 = vcmp.ge.f32.partialorder %v1967_v27, 0.0 }
 0x1b3   : > { %v4036_v30 = vpop.f32.mrf.mxu3 }
 0x1b4   : > { %v2159_v51 = vsel %vm2031_vm12, %v1967_v27, %v2095_v47  ;;  %v1534_v47 = vadd.f32 %v3944_v55, %v3821_v24 }
 0x1b5   : > { %v1652_v31 = vpop.f32.mrf.mxu2  ;;  %v1317_v42 = vpop.f32.mrf.mxu0 }
 0x1b6   : > { %v1653_v36 = vadd.f32 %v1652_v31, %v1484_v28  ;;  %v1486_v45 = vpop.f32.mrf.mxu1 }
 0x1b7   : > { %v1487_v59 = vadd.f32 %v1486_v45, %v1317_v42 }
 0x1b8   : > { %v1968_v48 = vadd.f32 %v4021_v53, %v1653_v36  ;;  %1356 = vmatmul.bf16.gmra.mxu0 %v2745_v32  ;;  %1734 = vmatmul.bf16.gmra.mxu3 %v2849_v33  ;;  %v1532_v32 = vadd.f32 %v3932_v34, %v3808_v7 }
 0x1b9   : > { %1525 = vmatmul.bf16.gmra.mxu1 %v2749_v43 }
 0x1ba   : > { %vm2032_vm13 = vcmp.ge.f32.partialorder %v1968_v48, 0.0  ;;  %v2096_v50 = vmul.f32 0.1, %v1968_v48  ;;  %1694 = vmatmul.bf16.gmra.mxu2 %v2753_v44 }
 0x1bb   : > { %v4039_v12 = vpop.f32.mrf.mxu3 }
 0x1bc   : > { %v2160_v52 = vsel %vm2032_vm13, %v1968_v48, %v2096_v50 }
 0x1bd   : > { %v3145_v60 = vpack.c.bf16 %v2160_v52, %v2159_v51  ;;  %v1655_v61 = vpop.f32.mrf.mxu2  ;;  %v1319_v62 = vpop.f32.mrf.mxu0 }
 0x1be   : > { %v1488_v2 = vpop.f32.mrf.mxu1  ;;  %v1656_v3 = vadd.f32 %v1655_v61, %v1487_v59 }
 0x1bf   : > { %3245 = vst [vmem:[%s3827_s22 + $0x70] sm:$0xff] %v3145_v60   ;;  %v1489_v6 = vadd.f32 %v1488_v2, %v1319_v62 }
 0x1c0   : > { %v1969_v4 = vadd.f32 %v4021_v53, %v1656_v3 }
 0x1c2   : > { %v2097_v20 = vmul.f32 0.1, %v1969_v4  ;;  %vm2033_vm14 = vcmp.ge.f32.partialorder %v1969_v4, 0.0 }
 0x1c3   : > { %v4043_v8 = vpop.f32.mrf.mxu3 }
 0x1c4   : > { %v2161_v26 = vsel %vm2033_vm14, %v1969_v4, %v2097_v20 }
 0x1c5   : > { %v1657_v11 = vpop.f32.mrf.mxu2  ;;  %v1322_v16 = vpop.f32.mrf.mxu0 }
 0x1c6   : > { %v1658_v14 = vadd.f32 %v1657_v11, %v1489_v6  ;;  %v1491_v18 = vpop.f32.mrf.mxu1 }
 0x1c7   : > { %v1492_v28 = vadd.f32 %v1491_v18, %v1322_v16 }
 0x1c8   : > { %v1970_v21 = vadd.f32 %v4021_v53, %v1658_v14 }
 0x1ca   : > { %vm2034_vm15 = vcmp.ge.f32.partialorder %v1970_v21, 0.0  ;;  %v2098_v22 = vmul.f32 0.1, %v1970_v21 }
 0x1cb   : > { %v1700_v31 = vpop.f32.mrf.mxu3 }
 0x1cc   : > { %v2162_v27 = vsel %vm2034_vm15, %v1970_v21, %v2098_v22  ;;  %v1701_v43 = vadd.f32 %v1700_v31, %v1532_v32  ;;  %v1537_v22 = vadd.f32 %v3947_v13, %v3825_v38 }
 0x1cd   : > { %v3150_v33 = vpack.c.bf16 %v2162_v27, %v2161_v26  ;;  %v1660_v36 = vpop.f32.mrf.mxu2  ;;  %v1324_v42 = vpop.f32.mrf.mxu0 }
 0x1ce   : > { %v1493_v44 = vpop.f32.mrf.mxu1  ;;  %v1661_v45 = vadd.f32 %v1660_v36, %v1492_v28  ;;  %v1987_v48 = vadd.f32 %v4021_v53, %v1701_v43  ;;  %v1539_v36 = vadd.f32 %v3959_v35, %v3839_v54 }
 0x1cf   : > { %3246 = vst [vmem:[%s3827_s22 + $0x78] sm:$0xff] %v3150_v33   ;;  %v1494_v51 = vadd.f32 %v1493_v44, %v1324_v42 }
 0x1d0   : > { %v1971_v50 = vadd.f32 %v4021_v53, %v1661_v45  ;;  %v2115_v34 = vmul.f32 0.1, %v1987_v48  ;;  %vm2051_vm0 = vcmp.ge.f32.partialorder %v1987_v48, 0.0 }
 0x1d2   : > { %v2099_v3 = vmul.f32 0.1, %v1971_v50  ;;  %vm2035_vm1 = vcmp.ge.f32.partialorder %v1971_v50, 0.0  ;;  %v2179_v6 = vsel %vm2051_vm0, %v1987_v48, %v2115_v34 }
 0x1d3   : > { %v1702_v52 = vpop.f32.mrf.mxu3 }
 0x1d4   : > { %v1703_v60 = vadd.f32 %v1702_v52, %v1534_v47  ;;  %v2163_v14 = vsel %vm2035_vm1, %v1971_v50, %v2099_v3 }
 0x1d5   : > { %v1662_v59 = vpop.f32.mrf.mxu2  ;;  %v1327_v7 = vpop.f32.mrf.mxu0 }
 0x1d6   : > { %v1663_v61 = vadd.f32 %v1662_v59, %v1494_v51  ;;  %v1988_v62 = vadd.f32 %v4021_v53, %v1703_v60  ;;  %v1496_v2 = vpop.f32.mrf.mxu1 }
 0x1d7   : > { %v1497_v20 = vadd.f32 %v1496_v2, %v1327_v7 }
 0x1d8   : > { %v1972_v4 = vadd.f32 %v4021_v53, %v1663_v61  ;;  %vm2052_vm2 = vcmp.ge.f32.partialorder %v1988_v62, 0.0  ;;  %v2116_v24 = vmul.f32 0.1, %v1988_v62 }
 0x1da   : > { %vm2036_vm3 = vcmp.ge.f32.partialorder %v1972_v4, 0.0  ;;  %v2100_v55 = vmul.f32 0.1, %v1972_v4  ;;  %v2180_v11 = vsel %vm2052_vm2, %v1988_v62, %v2116_v24  ;;  %v1542_v24 = vadd.f32 %v3962_v56, %v3842_v5 }
 0x1db   : > { %v3195_v18 = vpack.c.bf16 %v2180_v11, %v2179_v6  ;;  %v1705_v21 = vpop.f32.mrf.mxu3 }
 0x1dc   : > { %v2164_v16 = vsel %vm2036_vm3, %v1972_v4, %v2100_v55  ;;  %v1706_v31 = vadd.f32 %v1705_v21, %v1537_v22 }
 0x1dd   : > { %v3155_v26 = vpack.c.bf16 %v2164_v16, %v2163_v14  ;;  %v1665_v27 = vpop.f32.mrf.mxu2  ;;  %3255 = vst [vmem:[%s3827_s22 + $0xc0] sm:$0xff] %v3195_v18   ;;  %v1329_v28 = vpop.f32.mrf.mxu0 }
 0x1de   : > { %v1498_v32 = vpop.f32.mrf.mxu1  ;;  %v1666_v33 = vadd.f32 %v1665_v27, %v1497_v20  ;;  %v1989_v42 = vadd.f32 %v4021_v53, %v1706_v31  ;;  %v1544_v20 = vadd.f32 %v3974_v17, %v3854_v25 }
 0x1df   : > { %3247 = vst [vmem:[%s3827_s22 + $0x80] sm:$0xff] %v3155_v26   ;;  %v1499_v44 = vadd.f32 %v1498_v32, %v1329_v28 }
 0x1e0   : > { %v1973_v43 = vadd.f32 %v4021_v53, %v1666_v33  ;;  %v2117_v50 = vmul.f32 0.1, %v1989_v42  ;;  %vm2053_vm4 = vcmp.ge.f32.partialorder %v1989_v42, 0.0 }
 0x1e2   : > { %v2101_v59 = vmul.f32 0.1, %v1973_v43  ;;  %vm2037_vm5 = vcmp.ge.f32.partialorder %v1973_v43, 0.0  ;;  %v2181_v61 = vsel %vm2053_vm4, %v1989_v42, %v2117_v50 }
 0x1e3   : > { %v1707_v45 = vpop.f32.mrf.mxu3 }
 0x1e4   : > { %v1708_v48 = vadd.f32 %v1707_v45, %v1539_v36  ;;  %v2165_v34 = vsel %vm2037_vm5, %v1973_v43, %v2101_v59 }
 0x1e5   : > { %v1667_v47 = vpop.f32.mrf.mxu2  ;;  %v1332_v13 = vpop.f32.mrf.mxu0 }
 0x1e6   : > { %v1668_v38 = vadd.f32 %v1667_v47, %v1499_v44  ;;  %v1990_v51 = vadd.f32 %v4021_v53, %v1708_v48  ;;  %v1501_v52 = vpop.f32.mrf.mxu1 }
 0x1e7   : > { %v1502_v3 = vadd.f32 %v1501_v52, %v1332_v13 }
 0x1e8   : > { %v1974_v60 = vadd.f32 %v4021_v53, %v1668_v38  ;;  %vm2054_vm6 = vcmp.ge.f32.partialorder %v1990_v51, 0.0  ;;  %v2118_v54 = vmul.f32 0.1, %v1990_v51 }
 0x1ea   : > { %vm2038_vm7 = vcmp.ge.f32.partialorder %v1974_v60, 0.0  ;;  %v2102_v35 = vmul.f32 0.1, %v1974_v60  ;;  %v2182_v7 = vsel %vm2054_vm6, %v1990_v51, %v2118_v54  ;;  %v1547_v51 = vadd.f32 %v3977_v41, %v3857_v40 }
 0x1eb   : > { %v3200_v2 = vpack.c.bf16 %v2182_v7, %v2181_v61  ;;  %v1710_v4 = vpop.f32.mrf.mxu3  ;;  %v1549_v7 = vadd.f32 %v3989_v63, %v3869_v57 }
 0x1ec   : > { %v2166_v62 = vsel %vm2038_vm7, %v1974_v60, %v2102_v35  ;;  %v1711_v14 = vadd.f32 %v1710_v4, %v1542_v24 }
 0x1ed   : > { %v3160_v55 = vpack.c.bf16 %v2166_v62, %v2165_v34  ;;  %v1670_v6 = vpop.f32.mrf.mxu2  ;;  %3256 = vst [vmem:[%s3827_s22 + $0xc8] sm:$0xff] %v3200_v2   ;;  %v1334_v11 = vpop.f32.mrf.mxu0 }
 0x1ee   : > { %v1503_v16 = vpop.f32.mrf.mxu1  ;;  %v1671_v18 = vadd.f32 %v1670_v6, %v1502_v3  ;;  %v1991_v21 = vadd.f32 %v4021_v53, %v1711_v14 }
 0x1ef   : > { %3248 = vst [vmem:[%s3827_s22 + $0x88] sm:$0xff] %v3160_v55   ;;  %v1504_v26 = vadd.f32 %v1503_v16, %v1334_v11 }
 0x1f0   : > { %v1975_v22 = vadd.f32 %v4021_v53, %v1671_v18  ;;  %v2119_v32 = vmul.f32 0.1, %v1991_v21  ;;  %vm2055_vm8 = vcmp.ge.f32.partialorder %v1991_v21, 0.0 }
 0x1f2   : > { %v2103_v42 = vmul.f32 0.1, %v1975_v22  ;;  %vm2039_vm9 = vcmp.ge.f32.partialorder %v1975_v22, 0.0  ;;  %v2183_v44 = vsel %vm2055_vm8, %v1991_v21, %v2119_v32 }
 0x1f3   : > { %v1712_v27 = vpop.f32.mrf.mxu3 }
 0x1f4   : > { %v1713_v31 = vadd.f32 %v1712_v27, %v1544_v20  ;;  %v2167_v47 = vsel %vm2039_vm9, %v1975_v22, %v2103_v42 }
 0x1f5   : > { %v1672_v28 = vpop.f32.mrf.mxu2  ;;  %v1337_v56 = vpop.f32.mrf.mxu0 }
 0x1f6   : > { %v1673_v5 = vadd.f32 %v1672_v28, %v1504_v26  ;;  %v1992_v33 = vadd.f32 %v4021_v53, %v1713_v31  ;;  %v1506_v36 = vpop.f32.mrf.mxu1  ;;  %v1552_v31 = vadd.f32 %v3992_v23, %v3872_v10 }
 0x1f7   : > { %v1507_v13 = vadd.f32 %v1506_v36, %v1337_v56 }
 0x1f8   : > { %v1976_v43 = vadd.f32 %v4021_v53, %v1673_v5  ;;  %vm2056_vm10 = vcmp.ge.f32.partialorder %v1992_v33, 0.0  ;;  %v2120_v25 = vmul.f32 0.1, %v1992_v33 }
 0x1fa   : > { %vm2040_vm11 = vcmp.ge.f32.partialorder %v1976_v43, 0.0  ;;  %v2104_v17 = vmul.f32 0.1, %v1976_v43  ;;  %v2184_v45 = vsel %vm2056_vm10, %v1992_v33, %v2120_v25 }
 0x1fb   : > { %v3205_v38 = vpack.c.bf16 %v2184_v45, %v2183_v44  ;;  %v1715_v50 = vpop.f32.mrf.mxu3 }
 0x1fc   : > { %v2168_v48 = vsel %vm2040_vm11, %v1976_v43, %v2104_v17  ;;  %v1716_v54 = vadd.f32 %v1715_v50, %v1547_v51  ;;  %v1554_v43 = vadd.f32 %v4004_v49, %v3884_v29 }
 0x1fd   : > { %v3165_v52 = vpack.c.bf16 %v2168_v48, %v2167_v47  ;;  %v1675_v59 = vpop.f32.mrf.mxu2  ;;  %3257 = vst [vmem:[%s3827_s22 + $0xd0] sm:$0xff] %v3205_v38   ;;  %v1339_v60 = vpop.f32.mrf.mxu0 }
 0x1fe   : > { %v1508_v35 = vpop.f32.mrf.mxu1  ;;  %v1676_v61 = vadd.f32 %v1675_v59, %v1507_v13  ;;  %v1993_v34 = vadd.f32 %v4021_v53, %v1716_v54 }
 0x1ff   : > { %3249 = vst [vmem:[%s3827_s22 + $0x90] sm:$0xff] %v3165_v52   ;;  %v1509_v2 = vadd.f32 %v1508_v35, %v1339_v60 }
 0x200   : > { %v1977_v62 = vadd.f32 %v4021_v53, %v1676_v61  ;;  %v2121_v55 = vmul.f32 0.1, %v1993_v34  ;;  %vm2057_vm12 = vcmp.ge.f32.partialorder %v1993_v34, 0.0 }
 0x202   : > { %v2105_v14 = vmul.f32 0.1, %v1977_v62  ;;  %vm2041_vm13 = vcmp.ge.f32.partialorder %v1977_v62, 0.0  ;;  %v2185_v18 = vsel %vm2057_vm12, %v1993_v34, %v2121_v55  ;;  %v1559_v55 = vadd.f32 %v4019_v37, %v3899_v0 }
 0x203   : > { %v1717_v3 = vpop.f32.mrf.mxu3 }
 0x204   : > { %v1718_v24 = vadd.f32 %v1717_v3, %v1549_v7  ;;  %v2169_v21 = vsel %vm2041_vm13, %v1977_v62, %v2105_v14  ;;  %v1557_v62 = vadd.f32 %v4007_v9, %v3887_v46 }
 0x205   : > { %v1677_v4 = vpop.f32.mrf.mxu2  ;;  %v1342_v41 = vpop.f32.mrf.mxu0 }
 0x206   : > { %v1678_v40 = vadd.f32 %v1677_v4, %v1509_v2  ;;  %v1994_v6 = vadd.f32 %v4021_v53, %v1718_v24  ;;  %v1511_v11 = vpop.f32.mrf.mxu1 }
 0x207   : > { %v1512_v27 = vadd.f32 %v1511_v11, %v1342_v41 }
 0x208   : > { %v1978_v16 = vadd.f32 %v4021_v53, %v1678_v40  ;;  %vm2058_vm14 = vcmp.ge.f32.partialorder %v1994_v6, 0.0  ;;  %v2122_v57 = vmul.f32 0.1, %v1994_v6 }
 0x20a   : > { %vm2042_vm15 = vcmp.ge.f32.partialorder %v1978_v16, 0.0  ;;  %v2106_v63 = vmul.f32 0.1, %v1978_v16  ;;  %v2186_v20 = vsel %vm2058_vm14, %v1994_v6, %v2122_v57 }
 0x20b   : > { %v3210_v26 = vpack.c.bf16 %v2186_v20, %v2185_v18  ;;  %v1720_v28 = vpop.f32.mrf.mxu3 }
 0x20c   : > { %v2170_v22 = vsel %vm2042_vm15, %v1978_v16, %v2106_v63  ;;  %v1721_v33 = vadd.f32 %v1720_v28, %v1552_v31 }
 0x20d   : > { %v3170_v5 = vpack.c.bf16 %v2170_v22, %v2169_v21  ;;  %v1680_v56 = vpop.f32.mrf.mxu2  ;;  %3258 = vst [vmem:[%s3827_s22 + $0xd8] sm:$0xff] %v3210_v26   ;;  %v1344_v32 = vpop.f32.mrf.mxu0 }
 0x20e   : > { %v1513_v36 = vpop.f32.mrf.mxu1  ;;  %v1681_v42 = vadd.f32 %v1680_v56, %v1512_v27  ;;  %v1995_v25 = vadd.f32 %v4021_v53, %v1721_v33 }
 0x20f   : > { %3250 = vst [vmem:[%s3827_s22 + $0x98] sm:$0xff] %v3170_v5   ;;  %v1514_v44 = vadd.f32 %v1513_v36, %v1344_v32  ;;  %v1562_v36 = vadd.f32 %v4024_v1, %v3902_v19 }
 0x210   : > { %v1979_v17 = vadd.f32 %v4021_v53, %v1681_v42  ;;  %v2123_v38 = vmul.f32 0.1, %v1995_v25  ;;  %vm2059_vm0 = vcmp.ge.f32.partialorder %v1995_v25, 0.0 }
 0x212   : > { %v2107_v51 = vmul.f32 0.1, %v1979_v17  ;;  %vm2043_vm1 = vcmp.ge.f32.partialorder %v1979_v17, 0.0  ;;  %v2187_v59 = vsel %vm2059_vm0, %v1995_v25, %v2123_v38 }
 0x213   : > { %v1722_v45 = vpop.f32.mrf.mxu3 }
 0x214   : > { %v1723_v48 = vadd.f32 %v1722_v45, %v1554_v43  ;;  %v2171_v54 = vsel %vm2043_vm1, %v1979_v17, %v2107_v51 }
 0x215   : > { %v1682_v47 = vpop.f32.mrf.mxu2  ;;  %v1347_v23 = vpop.f32.mrf.mxu0 }
 0x216   : > { %v1683_v10 = vadd.f32 %v1682_v47, %v1514_v44  ;;  %v1996_v13 = vadd.f32 %v4021_v53, %v1723_v48  ;;  %v1516_v50 = vpop.f32.mrf.mxu1  ;;  %v1564_v47 = vadd.f32 %v4036_v30, %v3914_v39 }
 0x217   : > { %v1517_v7 = vadd.f32 %v1516_v50, %v1347_v23 }
 0x218   : > { %v1980_v52 = vadd.f32 %v4021_v53, %v1683_v10  ;;  %vm2060_vm2 = vcmp.ge.f32.partialorder %v1996_v13, 0.0  ;;  %v2124_v29 = vmul.f32 0.1, %v1996_v13 }
 0x21a   : > { %vm2044_vm3 = vcmp.ge.f32.partialorder %v1980_v52, 0.0  ;;  %v2108_v49 = vmul.f32 0.1, %v1980_v52  ;;  %v2188_v60 = vsel %vm2060_vm2, %v1996_v13, %v2124_v29 }
 0x21b   : > { %v3215_v61 = vpack.c.bf16 %v2188_v60, %v2187_v59  ;;  %v1725_v34 = vpop.f32.mrf.mxu3 }
 0x21c   : > { %v2172_v35 = vsel %vm2044_vm3, %v1980_v52, %v2108_v49  ;;  %v1726_v24 = vadd.f32 %v1725_v34, %v1557_v62 }
 0x21d   : > { %v3175_v2 = vpack.c.bf16 %v2172_v35, %v2171_v54  ;;  %v1685_v3 = vpop.f32.mrf.mxu2  ;;  %3259 = vst [vmem:[%s3827_s22 + $0xe0] sm:$0xff] %v3215_v61   ;;  %v1349_v4 = vpop.f32.mrf.mxu0 }
 0x21e   : > { %v1518_v40 = vpop.f32.mrf.mxu1  ;;  %v1686_v41 = vadd.f32 %v1685_v3, %v1517_v7  ;;  %v1997_v6 = vadd.f32 %v4021_v53, %v1726_v24 }
 0x21f   : > { %3251 = vst [vmem:[%s3827_s22 + $0xa0] sm:$0xff] %v3175_v2   ;;  %v1519_v14 = vadd.f32 %v1518_v40, %v1349_v4  ;;  %v1567_v2 = vadd.f32 %v4039_v12, %v3917_v58 }
 0x220   : > { %v1981_v11 = vadd.f32 %v4021_v53, %v1686_v41  ;;  %v2125_v18 = vmul.f32 0.1, %v1997_v6  ;;  %vm2061_vm4 = vcmp.ge.f32.partialorder %v1997_v6, 0.0 }
 0x222   : > { %v2109_v22 = vmul.f32 0.1, %v1981_v11  ;;  %vm2045_vm5 = vcmp.ge.f32.partialorder %v1981_v11, 0.0  ;;  %v2189_v27 = vsel %vm2061_vm4, %v1997_v6, %v2125_v18  ;;  %v1569_v6 = vadd.f32 %v4043_v8, %v3929_v15 }
 0x223   : > { %v1727_v16 = vpop.f32.mrf.mxu3 }
 0x224   : > { %v1728_v63 = vadd.f32 %v1727_v16, %v1559_v55  ;;  %v2173_v31 = vsel %vm2045_vm5, %v1981_v11, %v2109_v22 }
 0x225   : > { %v1687_v57 = vpop.f32.mrf.mxu2  ;;  %v1352_v9 = vpop.f32.mrf.mxu0 }
 0x226   : > { %v1688_v46 = vadd.f32 %v1687_v57, %v1519_v14  ;;  %v1998_v20 = vadd.f32 %v4021_v53, %v1728_v63  ;;  %v1521_v21 = vpop.f32.mrf.mxu1 }
 0x227   : > { %v1522_v32 = vadd.f32 %v1521_v21, %v1352_v9 }
 0x228   : > { %v1982_v26 = vadd.f32 %v4021_v53, %v1688_v46  ;;  %vm2062_vm6 = vcmp.ge.f32.partialorder %v1998_v20, 0.0  ;;  %v2126_v0 = vmul.f32 0.1, %v1998_v20 }
 0x22a   : > { %vm2046_vm7 = vcmp.ge.f32.partialorder %v1982_v26, 0.0  ;;  %v2110_v37 = vmul.f32 0.1, %v1982_v26  ;;  %v2190_v28 = vsel %vm2062_vm6, %v1998_v20, %v2126_v0 }
 0x22b   : > { %v3220_v56 = vpack.c.bf16 %v2190_v28, %v2189_v27  ;;  %v1730_v33 = vpop.f32.mrf.mxu3 }
 0x22c   : > { %v2174_v5 = vsel %vm2046_vm7, %v1982_v26, %v2110_v37  ;;  %v1731_v17 = vadd.f32 %v1730_v33, %v1562_v36 }
 0x22d   : > { %v3180_v42 = vpack.c.bf16 %v2174_v5, %v2173_v31  ;;  %v1690_v43 = vpop.f32.mrf.mxu2  ;;  %3260 = vst [vmem:[%s3827_s22 + $0xe8] sm:$0xff] %v3220_v56   ;;  %v1354_v25 = vpop.f32.mrf.mxu0 }
 0x22e   : > { %v1523_v44 = vpop.f32.mrf.mxu1  ;;  %v1691_v45 = vadd.f32 %v1690_v43, %v1522_v32  ;;  %v1999_v48 = vadd.f32 %v4021_v53, %v1731_v17 }
 0x22f   : > { %3252 = vst [vmem:[%s3827_s22 + $0xa8] sm:$0xff] %v3180_v42   ;;  %v1524_v23 = vadd.f32 %v1523_v44, %v1354_v25 }
 0x230   : > { %v1983_v10 = vadd.f32 %v4021_v53, %v1691_v45  ;;  %v2127_v1 = vmul.f32 0.1, %v1999_v48  ;;  %vm2063_vm8 = vcmp.ge.f32.partialorder %v1999_v48, 0.0 }
 0x232   : > { %v2111_v49 = vmul.f32 0.1, %v1983_v10  ;;  %vm2047_vm9 = vcmp.ge.f32.partialorder %v1983_v10, 0.0  ;;  %v2191_v60 = vsel %vm2063_vm8, %v1999_v48, %v2127_v1 }
 0x233   : > { %v1732_v38 = vpop.f32.mrf.mxu3 }
 0x234   : > { %v1733_v50 = vadd.f32 %v1732_v38, %v1564_v47  ;;  %v2175_v35 = vsel %vm2047_vm9, %v1983_v10, %v2111_v49 }
 0x235   : > { %v1692_v13 = vpop.f32.mrf.mxu2  ;;  %v1357_v52 = vpop.f32.mrf.mxu0 }
 0x236   : > { %v1693_v19 = vadd.f32 %v1692_v13, %v1524_v23  ;;  %v2000_v51 = vadd.f32 %v4021_v53, %v1733_v50  ;;  %v1526_v29 = vpop.f32.mrf.mxu1 }
 0x237   : > { %v1527_v34 = vadd.f32 %v1526_v29, %v1357_v52 }
 0x238   : > { %v1984_v59 = vadd.f32 %v4021_v53, %v1693_v19  ;;  %vm2064_vm10 = vcmp.ge.f32.partialorder %v2000_v51, 0.0  ;;  %v2128_v39 = vmul.f32 0.1, %v2000_v51 }
 0x23a   : > { %vm2048_vm11 = vcmp.ge.f32.partialorder %v1984_v59, 0.0  ;;  %v2112_v30 = vmul.f32 0.1, %v1984_v59  ;;  %v2192_v54 = vsel %vm2064_vm10, %v2000_v51, %v2128_v39 }
 0x23b   : > { %v3225_v7 = vpack.c.bf16 %v2192_v54, %v2191_v60  ;;  %v1735_v62 = vpop.f32.mrf.mxu3 }
 0x23c   : > { %v2176_v61 = vsel %vm2048_vm11, %v1984_v59, %v2112_v30  ;;  %v1736_v24 = vadd.f32 %v1735_v62, %v1567_v2 }
 0x23d   : > { %v3185_v3 = vpack.c.bf16 %v2176_v61, %v2175_v35  ;;  %v1695_v4 = vpop.f32.mrf.mxu2  ;;  %3261 = vst [vmem:[%s3827_s22 + $0xf0] sm:$0xff] %v3225_v7   ;;  %v1359_v41 = vpop.f32.mrf.mxu0 }
 0x23e   : > { %v1696_v40 = vadd.f32 %v1695_v4, %v1527_v34  ;;  %v1528_v55 = vpop.f32.mrf.mxu1  ;;  %v2001_v11 = vadd.f32 %v4021_v53, %v1736_v24 }
 0x23f   : > { %3253 = vst [vmem:[%s3827_s22 + $0xb0] sm:$0xff] %v3185_v3   ;;  %v1529_v16 = vadd.f32 %v1528_v55, %v1359_v41 }
 0x240   : > { %v1985_v14 = vadd.f32 %v4021_v53, %v1696_v40  ;;  %v2129_v46 = vmul.f32 0.1, %v2001_v11  ;;  %vm2065_vm12 = vcmp.ge.f32.partialorder %v2001_v11, 0.0 }
 0x242   : > { %v2113_v18 = vmul.f32 0.1, %v1985_v14  ;;  %vm2049_vm13 = vcmp.ge.f32.partialorder %v1985_v14, 0.0  ;;  %v2193_v21 = vsel %vm2065_vm12, %v2001_v11, %v2129_v46 }
 0x243   : > { %v1737_v57 = vpop.f32.mrf.mxu3 }
 0x244   : > { %v1738_v12 = vadd.f32 %v1737_v57, %v1569_v6  ;;  %v2177_v26 = vsel %vm2049_vm13, %v1985_v14, %v2113_v18 }
 0x245   : > { %v1697_v58 = vpop.f32.mrf.mxu2 }
 0x246   : > { %v1698_v63 = vadd.f32 %v1697_v58, %v1529_v16  ;;  %v2002_v9 = vadd.f32 %v4021_v53, %v1738_v12 }
 0x248   : > { %v1986_v15 = vadd.f32 %v4021_v53, %v1698_v63  ;;  %vm2066_vm14 = vcmp.ge.f32.partialorder %v2002_v9, 0.0  ;;  %v2130_v8 = vmul.f32 0.1, %v2002_v9 }
 0x24a   : > { %vm2050_vm15 = vcmp.ge.f32.partialorder %v1986_v15, 0.0  ;;  %v2114_v20 = vmul.f32 0.1, %v1986_v15  ;;  %v2194_v22 = vsel %vm2066_vm14, %v2002_v9, %v2130_v8 }
 0x24b   : > { %v3230_v37 = vpack.c.bf16 %v2194_v22, %v2193_v21 }
 0x24c   : > { %v2178_v0 = vsel %vm2050_vm15, %v1986_v15, %v2114_v20 }
 0x24d   : > { %v3190_v27 = vpack.c.bf16 %v2178_v0, %v2177_v26  ;;  %3262 = vst [vmem:[%s3827_s22 + $0xf8] sm:$0xff] %v3230_v37  }
 0x24f   : > { %3254 = vst [vmem:[%s3827_s22 + $0xb8] sm:$0xff] %v3190_v27  }
 0x250   : > { %3498 = shalt.err (!%p3495_p12)
}
 0x251   : > { %s3565_s11 = smov 64   ;;  %s3566_s29 = smov 4  }
 0x252   : > { %3300 = dma.vmem_to_hbm [thread:$0]  (%p3665_p5), %s2338_s15, 4096, %s2340_s4, %s2324_s5, %s3565_s11, %s3565_s11, %s3566_s29  }
 0x253 PF: > { %p3322_p13 = scmp.ge.s32.totalorder %s3557_s17, 2  ;;  %s2354_s20 = sand.u32 1, %s3537_s12  }
 0x254   : > { %s2355_s22 = scalar_lea.sflag [#allocation5], %s2354_s20 }
 0x255   : > { %p3314_p0 = pnand %p3322_p13, %p3636_p6 }
 0x257   : > { %p3315_p3 = pneg %p3314_p0 }
 0x259   : > { %3532 = dma.done.wait (%p3315_p3), %s2355_s22, 4096  }
 0x25a   : > { %3534 = vsyncadd (%p3315_p3), %s2355_s22, 4294963200  ;;  %s20_s17 = sadd.s32 1, %s3557_s17   ;;  %s4175_s12 = smov %s3541_s13 }
 0x25b   : > { %p17_p7 = scmp.ge.s32.totalorder %s20_s17, 16   ;;  %s4176_s13 = smov %s3545_s14 }
 0x25c   : > { %s4177_s14 = smov %s3673_s26  ;;  %s4178_s15 = smov %s3553_s16 }
 0x25d   : > { %s4179_s16 = smov %s4181_s10  ;;  %19 = sbr.rel (!%p17_p7) target bundleno = 7 (0x7), region = 95 }
 0x262   :  { %2361 = vsyncpa [#allocation4], 1 }
 0x263   :  { %2363 = vsyncpa [#allocation4 + $0x1], 1 }
 0x264   :  { %2364 = vsyncpa [#allocation7], 1 }
 0x265   :  { %2365 = vsyncpa [#allocation5], 1 }
 0x266   :  { %2367 = vsyncpa [#allocation5 + $0x1], 1 }

</bundles_post_ra>
